<compile_context>
chip_gen: v5e
topology: v5e:2x2
jax: 0.10.0
libtpu: 0.0.40
codegen_flags: <defaults>
</compile_context>

<pallas_src>
import jax
import jax.numpy as jnp
from jax.experimental import pallas as pl
from jax.experimental.pallas import tpu as pltpu

_LANE = 128


def actor_kernel(obs_ref, u_ref, w1_ref, b1_ref, w2_ref, b2_ref, out_ref):
    # ---- fc1 + ReLU (MXU matmul, f32 accumulate) ----
    h = jnp.dot(obs_ref[...], w1_ref[...], preferred_element_type=jnp.float32)
    h = jnp.maximum(h + b1_ref[...], 0.0)

    # ---- fc2 -> logits ----
    logits = jnp.dot(h, w2_ref[...], preferred_element_type=jnp.float32) + b2_ref[...]

    # ---- Bernoulli(logits): sigmoid & softplus share one EUP exp ----
    e = jnp.exp(-jnp.abs(logits))                        # EUP exp
    inv = pl.reciprocal(1.0 + e, approx=True)            # EUP recip (frees VALU)
    p = jnp.where(logits >= 0.0, inv, e * inv)           # stable sigmoid(z)
    p = jnp.clip(p, 0.0, 1.0)                            # guard approx overshoot
    sp = jnp.maximum(logits, 0.0) + jnp.log1p(e)         # softplus(z) = -log(1-p)

    actions = (u_ref[...] < p).astype(jnp.float32)
    log_probs = actions * logits - sp                    # a*log(p) + (1-a)*log(1-p)
    entropy = sp - logits * p                            # -p log p - (1-p) log(1-p)

    # Lane-dense writeback: put the batch axis on lanes.  The [block_b, A] ->
    # [A, block_b] transposes go through the (otherwise idle) XLU slot; the
    # stacked (3*A, block_b) tile is written as one contiguous unmasked DMA.
    out_ref[...] = jnp.concatenate([actions.T, log_probs.T, entropy.T], axis=0)


def actor_forward(obs, u, w1, b1, w2, b2, block_b=None):
    """obs: [B, obs_dim] f32.  u: [B, action_dim] uniforms in [0,1).
       w1: [obs_dim, 256], b1: [1, 256], w2: [256, action_dim], b2: [1, action_dim].
       Returns (actions, log_probs, entropy), each [B, action_dim] f32."""
    B, obs_dim = obs.shape
    hidden = w1.shape[1]
    action_dim = w2.shape[1]

    # ---- batch tiling: big tiles, padded batch (no full-batch fallback) ----
    if block_b is None:
        if B <= 1024:
            # Single tile: avoids per-step overhead on single-TC v5e/v6e; per-tile
            # VMEM is tiny (<1 MiB) so this is safe on every generation.
            block_b = ((B + _LANE - 1) // _LANE) * _LANE
        else:
            # 512-row tiles -> >=2 grid steps so the "parallel" batch axis shards
            # across both v7x TensorCores while staying near the HBM roofline.
            block_b = 512
    Bp = ((B + block_b - 1) // block_b) * block_b
    if Bp != B:
        obs = jnp.pad(obs, ((0, Bp - B), (0, 0)))
        u = jnp.pad(u, ((0, Bp - B), (0, 0)))
    grid = (Bp // block_b,)

    cost = pl.CostEstimate(
        flops=2 * Bp * (obs_dim * hidden + hidden * action_dim),
        transcendentals=2 * Bp * action_dim,
        bytes_accessed=4 * (Bp * (obs_dim + action_dim + 3 * action_dim)
                            + obs_dim * hidden + hidden
                            + hidden * action_dim + action_dim),
    )

    packed = pl.pallas_call(
        actor_kernel,
        out_shape=jax.ShapeDtypeStruct((3 * action_dim, Bp), jnp.float32),
        grid=grid,
        in_specs=[
            # streamed per batch tile (double-buffered by BlockSpec pipelining)
            pl.BlockSpec((block_b, obs_dim), lambda i: (i, 0)),
            pl.BlockSpec((block_b, action_dim), lambda i: (i, 0)),
            # weights/biases: constant block index -> stay resident in VMEM
            pl.BlockSpec((obs_dim, hidden), lambda i: (0, 0)),
            pl.BlockSpec((1, hidden), lambda i: (0, 0)),
            pl.BlockSpec((hidden, action_dim), lambda i: (0, 0)),
            pl.BlockSpec((1, action_dim), lambda i: (0, 0)),
        ],
        # batch on the lane axis: (3*A, block_b) lane-dense output block
        out_specs=pl.BlockSpec((3 * action_dim, block_b), lambda i: (0, i)),
        compiler_params=pltpu.CompilerParams(
            dimension_semantics=("parallel",)),      # megacore sharding on v7x
        cost_estimate=cost,
    )(obs, u, w1, b1, w2, b2)

    # Cheap XLA-side unpack / transpose back to [B, action_dim].
    packed = packed[:, :B]
    actions = packed[0:action_dim].T
    log_probs = packed[action_dim:2 * action_dim].T
    entropy = packed[2 * action_dim:].T
    return actions, log_probs, entropy


if __name__ == "__main__":
    # Shapes consistent with the module: obs_dim = dim_x + dim_y, action_dim = dim_x.
    B, OBS_DIM, HIDDEN, ACTION_DIM = 256, 32, 256, 16

    key = jax.random.PRNGKey(0)
    k_obs, k_w1, k_b1, k_w2, k_b2, k_u = jax.random.split(key, 6)

    obs = jax.random.normal(k_obs, (B, OBS_DIM), dtype=jnp.float32)

    # PyTorch-Linear-like uniform fan-in init, stored transposed as [in, out].
    lim1 = 1.0 / jnp.sqrt(OBS_DIM)
    w1 = jax.random.uniform(k_w1, (OBS_DIM, HIDDEN), jnp.float32, -lim1, lim1)
    b1 = jax.random.uniform(k_b1, (1, HIDDEN), jnp.float32, -lim1, lim1)
    lim2 = 1.0 / jnp.sqrt(HIDDEN)
    w2 = jax.random.uniform(k_w2, (HIDDEN, ACTION_DIM), jnp.float32, -lim2, lim2)
    b2 = jax.random.uniform(k_b2, (1, ACTION_DIM), jnp.float32, -lim2, lim2)

    # TODO(synk): torch Bernoulli.sample() uses torch's global RNG; here uniforms
    # come from jax.random and are streamed into the kernel (same distribution).
    # An in-kernel pltpu.prng_seed/prng_random_bits path would drop this input
    # stream (~17% of HBM traffic) on real hardware.
    u = jax.random.uniform(k_u, (B, ACTION_DIM), dtype=jnp.float32)

    actions, log_probs, entropy = actor_forward(obs, u, w1, b1, w2, b2)
    jax.block_until_ready((actions, log_probs, entropy))

    # ---- pure-JAX reference check ----
    h_ref = jnp.maximum(obs @ w1 + b1, 0.0)
    z_ref = h_ref @ w2 + b2
    p_ref = jax.nn.sigmoid(z_ref)
    sp_ref = jax.nn.softplus(z_ref)

    eps = 1e-3
    assert actions.shape == (B, ACTION_DIM)
    assert bool(jnp.all((actions == 0.0) | (actions == 1.0)))
    assert bool(jnp.allclose(log_probs, actions * z_ref - sp_ref, atol=2e-3, rtol=2e-3))
    assert bool(jnp.allclose(entropy, sp_ref - z_ref * p_ref, atol=2e-3, rtol=2e-3))
    assert bool(jnp.all(log_probs <= eps))
    assert bool(jnp.all((entropy >= -eps) & (entropy <= jnp.log(2.0) + eps)))

    print("KERNEL_OK")
</pallas_src>

<mosaic_0001>
module attributes {stable_mosaic.version = 11 : i64} {
  func.func @actor_kernel(%arg0: i32, %arg1: memref<256x32xf32, #tpu.memory_space<vmem>>, %arg2: memref<256x16xf32, #tpu.memory_space<vmem>>, %arg3: memref<32x256xf32, #tpu.memory_space<vmem>>, %arg4: memref<1x256xf32, #tpu.memory_space<vmem>>, %arg5: memref<256x16xf32, #tpu.memory_space<vmem>>, %arg6: memref<1x16xf32, #tpu.memory_space<vmem>>, %arg7: memref<48x256xf32, #tpu.memory_space<vmem>>) attributes {dimension_semantics = [#tpu.dimension_semantics<parallel>], iteration_bounds = array<i64: 1>, scalar_prefetch = 0 : i64, scratch_operands = 0 : i64, tpu.core_type = #tpu.core_type<tc>, window_params = [{transform_indices = @transform_0, window_bounds = array<i64: 256, 32>}, {transform_indices = @transform_1, window_bounds = array<i64: 256, 16>}, {pipeline_mode = #tpu.pipeline_mode<synchronous>, transform_indices = @transform_2, window_bounds = array<i64: 32, 256>}, {pipeline_mode = #tpu.pipeline_mode<synchronous>, transform_indices = @transform_3, window_bounds = array<i64: 1, 256>}, {pipeline_mode = #tpu.pipeline_mode<synchronous>, transform_indices = @transform_4, window_bounds = array<i64: 256, 16>}, {pipeline_mode = #tpu.pipeline_mode<synchronous>, transform_indices = @transform_5, window_bounds = array<i64: 1, 16>}, {transform_indices = @transform_6, window_bounds = array<i64: 48, 256>}]} {
    %c0 = arith.constant 0 : index
    %c0_0 = arith.constant 0 : index
    %0 = vector.load %arg1[%c0, %c0_0] : memref<256x32xf32, #tpu.memory_space<vmem>>, vector<256x32xf32>
    %c0_1 = arith.constant 0 : index
    %c0_2 = arith.constant 0 : index
    %1 = vector.load %arg3[%c0_1, %c0_2] : memref<32x256xf32, #tpu.memory_space<vmem>>, vector<32x256xf32>
    %cst = arith.constant dense<0.000000e+00> : vector<256x256xf32>
    %2 = tpu.matmul %0, %1, %cst {dimension_numbers = #tpu.dot_dimension_numbers<[1], [0], [0], [1], [0, 0, 1, 1], [], []>} : vector<256x32xf32>, vector<32x256xf32>, vector<256x256xf32> -> vector<256x256xf32>
    %c0_3 = arith.constant 0 : index
    %c0_4 = arith.constant 0 : index
    %3 = vector.load %arg4[%c0_3, %c0_4] : memref<1x256xf32, #tpu.memory_space<vmem>>, vector<1x256xf32>
    %4 = vector.broadcast %3 : vector<1x256xf32> to vector<256x256xf32>
    %5 = arith.addf %2, %4 : vector<256x256xf32>
    %cst_5 = arith.constant 0.000000e+00 : f32
    %6 = vector.broadcast %cst_5 : f32 to vector<256x256xf32>
    %7 = arith.maximumf %5, %6 : vector<256x256xf32>
    %c0_6 = arith.constant 0 : index
    %c0_7 = arith.constant 0 : index
    %8 = vector.load %arg5[%c0_6, %c0_7] : memref<256x16xf32, #tpu.memory_space<vmem>>, vector<256x16xf32>
    %cst_8 = arith.constant dense<0.000000e+00> : vector<256x16xf32>
    %9 = tpu.matmul %7, %8, %cst_8 {dimension_numbers = #tpu.dot_dimension_numbers<[1], [0], [0], [1], [0, 0, 1, 1], [], []>} : vector<256x256xf32>, vector<256x16xf32>, vector<256x16xf32> -> vector<256x16xf32>
    %c0_9 = arith.constant 0 : index
    %c0_10 = arith.constant 0 : index
    %10 = vector.load %arg6[%c0_9, %c0_10] : memref<1x16xf32, #tpu.memory_space<vmem>>, vector<1x16xf32>
    %11 = vector.broadcast %10 : vector<1x16xf32> to vector<256x16xf32>
    %12 = arith.addf %9, %11 : vector<256x16xf32>
    %13 = math.absf %12 : vector<256x16xf32>
    %cst_11 = arith.constant 0.000000e+00 : f32
    %14 = vector.broadcast %cst_11 : f32 to vector<256x16xf32>
    %15 = arith.subf %14, %13 : vector<256x16xf32>
    %16 = math.exp %15 : vector<256x16xf32>
    %cst_12 = arith.constant 1.000000e+00 : f32
    %17 = vector.broadcast %cst_12 : f32 to vector<256x16xf32>
    %18 = arith.addf %17, %16 : vector<256x16xf32>
    %19 = tpu.reciprocal %18 {approx = true} : vector<256x16xf32> -> vector<256x16xf32>
    %cst_13 = arith.constant 0.000000e+00 : f32
    %20 = vector.broadcast %cst_13 : f32 to vector<256x16xf32>
    %21 = arith.cmpf oge, %12, %20 : vector<256x16xf32>
    %22 = arith.mulf %16, %19 : vector<256x16xf32>
    %23 = arith.select %21, %19, %22 : vector<256x16xi1>, vector<256x16xf32>
    %cst_14 = arith.constant 0.000000e+00 : f32
    %cst_15 = arith.constant 1.000000e+00 : f32
    %24 = vector.broadcast %cst_14 : f32 to vector<256x16xf32>
    %25 = arith.maximumf %24, %23 : vector<256x16xf32>
    %26 = vector.broadcast %cst_15 : f32 to vector<256x16xf32>
    %27 = arith.minimumf %26, %25 : vector<256x16xf32>
    %cst_16 = arith.constant 0.000000e+00 : f32
    %28 = vector.broadcast %cst_16 : f32 to vector<256x16xf32>
    %29 = arith.maximumf %12, %28 : vector<256x16xf32>
    %30 = math.log1p %16 : vector<256x16xf32>
    %31 = arith.addf %29, %30 : vector<256x16xf32>
    %c0_17 = arith.constant 0 : index
    %c0_18 = arith.constant 0 : index
    %32 = vector.load %arg2[%c0_17, %c0_18] : memref<256x16xf32, #tpu.memory_space<vmem>>, vector<256x16xf32>
    %33 = arith.cmpf olt, %32, %27 : vector<256x16xf32>
    %34 = arith.extui %33 : vector<256x16xi1> to vector<256x16xi32>
    %35 = arith.sitofp %34 : vector<256x16xi32> to vector<256x16xf32>
    %36 = arith.mulf %35, %12 : vector<256x16xf32>
    %37 = arith.subf %36, %31 : vector<256x16xf32>
    %38 = arith.mulf %12, %27 : vector<256x16xf32>
    %39 = arith.subf %31, %38 : vector<256x16xf32>
    %40 = tpu.transpose %35, [1, 0] : vector<256x16xf32> -> vector<16x256xf32>
    %41 = tpu.transpose %37, [1, 0] : vector<256x16xf32> -> vector<16x256xf32>
    %42 = tpu.transpose %39, [1, 0] : vector<256x16xf32> -> vector<16x256xf32>
    %43 = tpu.concatenate %40, %41, %42 in 0 : vector<16x256xf32>, vector<16x256xf32>, vector<16x256xf32> -> vector<48x256xf32>
    %c0_19 = arith.constant 0 : index
    %c0_20 = arith.constant 0 : index
    %44 = vector.load %arg7[%c0_19, %c0_20] : memref<48x256xf32, #tpu.memory_space<vmem>>, vector<48x256xf32>
    tpu.vector_store %arg7[%c0_19, %c0_20], %43 {strides = array<i32>} : memref<48x256xf32, #tpu.memory_space<vmem>>, vector<48x256xf32>,
    return
  }
  func.func @transform_0(%arg0: i32) -> (i32, i32) {
    %c0_i32 = arith.constant 0 : i32
    %c0_i32_0 = arith.constant 0 : i32
    return %arg0, %c0_i32 : i32, i32
  }
  func.func @transform_1(%arg0: i32) -> (i32, i32) {
    %c0_i32 = arith.constant 0 : i32
    %c0_i32_0 = arith.constant 0 : i32
    return %arg0, %c0_i32 : i32, i32
  }
  func.func @transform_2(%arg0: i32) -> (i32, i32) {
    %c0_i32 = arith.constant 0 : i32
    %c0_i32_0 = arith.constant 0 : i32
    %c0_i32_1 = arith.constant 0 : i32
    return %c0_i32, %c0_i32_0 : i32, i32
  }
  func.func @transform_3(%arg0: i32) -> (i32, i32) {
    %c0_i32 = arith.constant 0 : i32
    %c0_i32_0 = arith.constant 0 : i32
    %c0_i32_1 = arith.constant 0 : i32
    return %c0_i32, %c0_i32_0 : i32, i32
  }
  func.func @transform_4(%arg0: i32) -> (i32, i32) {
    %c0_i32 = arith.constant 0 : i32
    %c0_i32_0 = arith.constant 0 : i32
    %c0_i32_1 = arith.constant 0 : i32
    return %c0_i32, %c0_i32_0 : i32, i32
  }
  func.func @transform_5(%arg0: i32) -> (i32, i32) {
    %c0_i32 = arith.constant 0 : i32
    %c0_i32_0 = arith.constant 0 : i32
    %c0_i32_1 = arith.constant 0 : i32
    return %c0_i32, %c0_i32_0 : i32, i32
  }
  func.func @transform_6(%arg0: i32) -> (i32, i32) {
    %c0_i32 = arith.constant 0 : i32
    %c0_i32_0 = arith.constant 0 : i32
    return %c0_i32, %arg0 : i32, i32
  }
}

</mosaic_0001>

<bundles_post_ra>
// kernel: tpu_custom_call.1
= control target key start
LH: loop header
LB: loop body
LE: loop exit
PB: predicated region body
PF: predicated region fallthrough
CT: control target
= control target key end

     0   :  { %vm70_vm0 = vcmask 261120   ;;  %s4110_s0 = inlined_call_operand.vmem [shape: f32[256,32], index: 0, kind: input, shape index: {}]   ;;  %s4111_s1 = inlined_call_operand.vmem [shape: f32[256,16], index: 1, kind: input, shape index: {}]   ;;  %s4112_s2 = inlined_call_operand.vmem [shape: f32[32,256], index: 2, kind: input, shape index: {}]   ;;  %s4113_s3 = inlined_call_operand.vmem [shape: f32[1,256], index: 3, kind: input, shape index: {}]   ;;  %s4114_s4 = inlined_call_operand.vmem [shape: f32[256,16], index: 4, kind: input, shape index: {}]   ;;  %s4115_s5 = inlined_call_operand.vmem [shape: f32[1,16], index: 5, kind: input, shape index: {}]   ;;  %s4116_s6 = inlined_call_operand.hbm [shape: f32[48,256], index: 6, kind: output, shape index: {}]  }
   0x1   :  { %v62_v0 = vld [vmem:[%s4112_s2 + $0x30] sm:$0xff]  ;;  %v63_v1 = vld [vmem:[%s4112_s2 + $0x38] sm:$0xff]  ;;  %v60_v2 = vld [vmem:[%s4112_s2 + $0x20] sm:$0xff] }
   0x2   :  { %179 = vmatpush.msra.mxu0 %v62_v0  ;;  %292 = vmatpush.msra.mxu1 %v63_v1  ;;  %v61_v3 = vld [vmem:[%s4112_s2 + $0x28] sm:$0xff]  ;;  %v58_v4 = vld [vmem:[%s4112_s2 + $0x10] sm:$0xff]  ;;  %v59_v5 = vld [vmem:[%s4112_s2 + $0x18] sm:$0xff] }
   0x3   :  { %v472_v6 = vld [vmem:[%s4114_s4 + $0x78] sm:$0xff]  ;;  %v56_v8 = vld [vmem:[%s4112_s2] sm:$0xff]  ;;  %v57_v9 = vld [vmem:[%s4112_s2 + $0x8] sm:$0xff] }
   0x4   :  { %180 = vmatpush.msra.mxu0 %v60_v2  ;;  %293 = vmatpush.msra.mxu1 %v61_v3  ;;  %v488_v7 = vld [vmem:[%s4114_s4 + $0xf8] sm:$0xff]  ;;  %v471_v10 = vld [vmem:[%s4114_s4 + $0x70] sm:$0xff]  ;;  %v24_v11 = vld [vmem:[%s4110_s0] sm:$0xff] }
   0x5   :  { %1997 = vmatpush.msra.mxu2 %v472_v6  ;;  %2013 = vmatpush.msra.mxu3 %v488_v7  ;;  %v487_v12 = vld [vmem:[%s4114_s4 + $0xf0] sm:$0xff] }
   0x6   :  { %181 = vmatpush.msra.mxu0 %v58_v4  ;;  %294 = vmatpush.msra.mxu1 %v59_v5 }
   0x7   :  { %1998 = vmatpush.msra.mxu2 %v471_v10  ;;  %2014 = vmatpush.msra.mxu3 %v487_v12 }
   0x8   :  { %11 = vsyncpa [#allocation3], 0  ;;  %182 = vmatpush.msra.mxu0 %v56_v8  ;;  %295 = vmatpush.msra.mxu1 %v57_v9  ;;  %v470_v13 = vld [vmem:[%s4114_s4 + $0x68] sm:$0xff]  ;;  %v26_v16 = vld [vmem:[%s4110_s0 + $0x10] sm:$0xff]  ;;  %s1889_s28 = sshll.u32 %s4116_s6, 4  ;;  %s2298_s29 = smov 256   ;;  %s1890_s28 = int_to_ptr.hbm [resolvable:$true] %s1889_s28 }
   0x9   :  { %1901 = vmatmul.msk.f32.vlgmr.msra.gmra.mxu0 %vm70_vm0, %v24_v11  ;;  %1933 = vmatmul.msk.f32.vlgmr.msra.gmra.mxu1 %vm70_vm0, %v24_v11  ;;  %v25_v14 = vld [vmem:[%s4110_s0 + $0x8] sm:$0xff]  ;;  %v469_v17 = vld [vmem:[%s4114_s4 + $0x60] sm:$0xff]  ;;  %v27_v18 = vld [vmem:[%s4110_s0 + $0x18] sm:$0xff]  ;;  %s2299_s30 = smov 16  }
   0xa   :  { %493 = vmatpush.msrb.mxu0 %v472_v6  ;;  %606 = vmatpush.msrb.mxu1 %v488_v7  ;;  %v486_v15 = vld [vmem:[%s4114_s4 + $0xe8] sm:$0xff]  ;;  %v485_v19 = vld [vmem:[%s4114_s4 + $0xe0] sm:$0xff]  ;;  %v468_v21 = vld [vmem:[%s4114_s4 + $0x58] sm:$0xff] }
   0xb   :  { %1999 = vmatpush.msra.mxu2 %v470_v13  ;;  %2015 = vmatpush.msra.mxu3 %v486_v15  ;;  %v28_v20 = vld [vmem:[%s4110_s0 + $0x20] sm:$0xff]  ;;  %v29_v22 = vld [vmem:[%s4110_s0 + $0x28] sm:$0xff]  ;;  %v484_v23 = vld [vmem:[%s4114_s4 + $0xd8] sm:$0xff] }
   0xc   :  { %494 = vmatpush.msrb.mxu0 %v471_v10  ;;  %607 = vmatpush.msrb.mxu1 %v487_v12  ;;  %v30_v24 = vld [vmem:[%s4110_s0 + $0x30] sm:$0xff]  ;;  %v31_v26 = vld [vmem:[%s4110_s0 + $0x38] sm:$0xff]  ;;  %v32_v28 = vld [vmem:[%s4110_s0 + $0x40] sm:$0xff] }
   0xd   :  { %2000 = vmatpush.msra.mxu2 %v469_v17  ;;  %2016 = vmatpush.msra.mxu3 %v485_v19  ;;  %v467_v25 = vld [vmem:[%s4114_s4 + $0x50] sm:$0xff]  ;;  %v466_v29 = vld [vmem:[%s4114_s4 + $0x48] sm:$0xff]  ;;  %v465_v33 = vld [vmem:[%s4114_s4 + $0x40] sm:$0xff] }
   0xe   :  { %495 = vmatpush.msrb.mxu0 %v470_v13  ;;  %608 = vmatpush.msrb.mxu1 %v486_v15  ;;  %v483_v27 = vld [vmem:[%s4114_s4 + $0xd0] sm:$0xff]  ;;  %v33_v30 = vld [vmem:[%s4110_s0 + $0x48] sm:$0xff]  ;;  %v35_v34 = vld [vmem:[%s4110_s0 + $0x58] sm:$0xff] }
   0xf   :  { %2001 = vmatpush.msra.mxu2 %v468_v21  ;;  %2017 = vmatpush.msra.mxu3 %v484_v23  ;;  %v482_v31 = vld [vmem:[%s4114_s4 + $0xc8] sm:$0xff]  ;;  %v34_v32 = vld [vmem:[%s4110_s0 + $0x50] sm:$0xff]  ;;  %v481_v35 = vld [vmem:[%s4114_s4 + $0xc0] sm:$0xff] }
  0x10   :  { %496 = vmatpush.msrb.mxu0 %v469_v17  ;;  %609 = vmatpush.msrb.mxu1 %v485_v19  ;;  %v464_v36 = vld [vmem:[%s4114_s4 + $0x38] sm:$0xff]  ;;  %v463_v37 = vld [vmem:[%s4114_s4 + $0x30] sm:$0xff]  ;;  %v36_v39 = vld [vmem:[%s4110_s0 + $0x60] sm:$0xff] }
  0x11   :  { %1902 = vmatmul.msk.f32.gmra.mxu0 %vm70_vm0, %v25_v14  ;;  %1934 = vmatmul.msk.f32.gmra.mxu1 %vm70_vm0, %v25_v14  ;;  %v480_v38 = vld [vmem:[%s4114_s4 + $0xb8] sm:$0xff]  ;;  %v462_v40 = vld [vmem:[%s4114_s4 + $0x28] sm:$0xff]  ;;  %v479_v41 = vld [vmem:[%s4114_s4 + $0xb0] sm:$0xff] }
  0x12   :  { %497 = vmatpush.msrb.mxu0 %v468_v21  ;;  %610 = vmatpush.msrb.mxu1 %v484_v23  ;;  %v461_v42 = vld [vmem:[%s4114_s4 + $0x20] sm:$0xff]  ;;  %v478_v43 = vld [vmem:[%s4114_s4 + $0xa8] sm:$0xff]  ;;  %v460_v44 = vld [vmem:[%s4114_s4 + $0x18] sm:$0xff] }
  0x13   :  { %2002 = vmatpush.msra.mxu2 %v467_v25  ;;  %2018 = vmatpush.msra.mxu3 %v483_v27  ;;  %v477_v45 = vld [vmem:[%s4114_s4 + $0xa0] sm:$0xff]  ;;  %v459_v46 = vld [vmem:[%s4114_s4 + $0x10] sm:$0xff]  ;;  %v476_v47 = vld [vmem:[%s4114_s4 + $0x98] sm:$0xff] }
  0x14   :  { %498 = vmatpush.msrb.mxu0 %v467_v25  ;;  %611 = vmatpush.msrb.mxu1 %v483_v27  ;;  %v37_v48 = vld [vmem:[%s4110_s0 + $0x68] sm:$0xff]  ;;  %v475_v50 = vld [vmem:[%s4114_s4 + $0x90] sm:$0xff]  ;;  %v457_v51 = vld [vmem:[%s4114_s4] sm:$0xff] }
  0x15   :  { %2003 = vmatpush.msra.mxu2 %v466_v29  ;;  %2019 = vmatpush.msra.mxu3 %v482_v31  ;;  %v458_v49 = vld [vmem:[%s4114_s4 + $0x8] sm:$0xff]  ;;  %v473_v53 = vld [vmem:[%s4114_s4 + $0x80] sm:$0xff]  ;;  %v38_v54 = vld [vmem:[%s4110_s0 + $0x70] sm:$0xff] }
  0x16   :  { %499 = vmatpush.msrb.mxu0 %v466_v29  ;;  %612 = vmatpush.msrb.mxu1 %v482_v31  ;;  %v474_v52 = vld [vmem:[%s4114_s4 + $0x88] sm:$0xff]  ;;  %v39_v55 = vld [vmem:[%s4110_s0 + $0x78] sm:$0xff]  ;;  %v40_v58 = vld [vmem:[%s4110_s0 + $0x80] sm:$0xff] }
  0x17   :  { %2004 = vmatpush.msra.mxu2 %v465_v33  ;;  %2020 = vmatpush.msra.mxu3 %v481_v35  ;;  %v64_v59 = vld [vmem:[%s4113_s3] sm:$0x3]  ;;  %v41_v0 = vld [vmem:[%s4110_s0 + $0x88] sm:$0xff]  ;;  %v42_v7 = vld [vmem:[%s4110_s0 + $0x90] sm:$0xff] }
  0x18   :  { %500 = vmatpush.msrb.mxu0 %v465_v33  ;;  %613 = vmatpush.msrb.mxu1 %v481_v35  ;;  %v2547_v60 = vperm.slane %v64_v59, 0  ;;  %v2549_v61 = vperm.slane %v64_v59, 1  ;;  %v43_v14 = vld [vmem:[%s4110_s0 + $0x98] sm:$0xff]  ;;  %v44_v21 = vld [vmem:[%s4110_s0 + $0xa0] sm:$0xff]  ;;  %v46_v35 = vld [vmem:[%s4110_s0 + $0xb0] sm:$0xff] }
  0x19   :  { %1903 = vmatmul.msk.f32.gmra.mxu0 %vm70_vm0, %v26_v16  ;;  %1935 = vmatmul.msk.f32.gmra.mxu1 %vm70_vm0, %v26_v16 }
  0x1a   :  { %2005 = vmatpush.msra.mxu2 %v464_v36  ;;  %501 = vmatpush.msrb.mxu0 %v464_v36 }
  0x1b   :  { %2021 = vmatpush.msra.mxu3 %v480_v38  ;;  %614 = vmatpush.msrb.mxu1 %v480_v38 }
  0x1c   :  { %2006 = vmatpush.msra.mxu2 %v463_v37  ;;  %502 = vmatpush.msrb.mxu0 %v463_v37 }
  0x1d   :  { %2022 = vmatpush.msra.mxu3 %v479_v41  ;;  %615 = vmatpush.msrb.mxu1 %v479_v41 }
  0x1e   :  { %2007 = vmatpush.msra.mxu2 %v462_v40  ;;  %503 = vmatpush.msrb.mxu0 %v462_v40 }
  0x1f   :  { %2023 = vmatpush.msra.mxu3 %v478_v43  ;;  %616 = vmatpush.msrb.mxu1 %v478_v43 }
  0x20   :  { %2008 = vmatpush.msra.mxu2 %v461_v42  ;;  %504 = vmatpush.msrb.mxu0 %v461_v42  ;;  %v47_v42 = vld [vmem:[%s4110_s0 + $0xb8] sm:$0xff] }
  0x21   :  { %1904 = vmatmul.msk.f32.gmra.mxu0 %vm70_vm0, %v27_v18  ;;  %1936 = vmatmul.msk.f32.gmra.mxu1 %vm70_vm0, %v27_v18 }
  0x22   :  { %2009 = vmatpush.msra.mxu2 %v460_v44  ;;  %2024 = vmatpush.msra.mxu3 %v477_v45 }
  0x23   :  { %617 = vmatpush.msrb.mxu1 %v477_v45  ;;  %505 = vmatpush.msrb.mxu0 %v460_v44 }
  0x24   :  { %2010 = vmatpush.msra.mxu2 %v459_v46  ;;  %2025 = vmatpush.msra.mxu3 %v476_v47 }
  0x25   :  { %618 = vmatpush.msrb.mxu1 %v476_v47  ;;  %506 = vmatpush.msrb.mxu0 %v459_v46 }
  0x26   :  { %2011 = vmatpush.msra.mxu2 %v458_v49  ;;  %2026 = vmatpush.msra.mxu3 %v475_v50 }
  0x27   :  { %619 = vmatpush.msrb.mxu1 %v475_v50  ;;  %507 = vmatpush.msrb.mxu0 %v458_v49  ;;  %v48_v49 = vld [vmem:[%s4110_s0 + $0xc0] sm:$0xff] }
  0x28   :  { %2012 = vmatpush.msra.mxu2 %v457_v51  ;;  %2027 = vmatpush.msra.mxu3 %v474_v52 }
  0x29   :  { %1905 = vmatmul.msk.f32.gmra.mxu0 %vm70_vm0, %v28_v20  ;;  %1937 = vmatmul.msk.f32.gmra.mxu1 %vm70_vm0, %v28_v20 }
  0x2a   :  { %2028 = vmatpush.msra.mxu3 %v473_v53  ;;  %620 = vmatpush.msrb.mxu1 %v474_v52 }
  0x2b   :  { %508 = vmatpush.msrb.mxu0 %v457_v51 }
  0x2c   :  { %621 = vmatpush.msrb.mxu1 %v473_v53 }
  0x31   :  { %1906 = vmatmul.msk.f32.gmra.mxu0 %vm70_vm0, %v29_v22  ;;  %1938 = vmatmul.msk.f32.gmra.mxu1 %vm70_vm0, %v29_v22 }
  0x39   :  { %1907 = vmatmul.msk.f32.gmra.mxu0 %vm70_vm0, %v30_v24  ;;  %1939 = vmatmul.msk.f32.gmra.mxu1 %vm70_vm0, %v30_v24 }
  0x41   :  { %1908 = vmatmul.msk.f32.gmra.mxu0 %vm70_vm0, %v31_v26  ;;  %1940 = vmatmul.msk.f32.gmra.mxu1 %vm70_vm0, %v31_v26 }
  0x49   :  { %1909 = vmatmul.msk.f32.gmra.mxu0 %vm70_vm0, %v32_v28  ;;  %1941 = vmatmul.msk.f32.gmra.mxu1 %vm70_vm0, %v32_v28  ;;  %v45_v28 = vld [vmem:[%s4110_s0 + $0xa8] sm:$0xff] }
  0x51   :  { %1910 = vmatmul.msk.f32.gmra.mxu0 %vm70_vm0, %v33_v30  ;;  %1942 = vmatmul.msk.f32.gmra.mxu1 %vm70_vm0, %v33_v30 }
  0x59   :  { %1911 = vmatmul.msk.f32.gmra.mxu0 %vm70_vm0, %v34_v32  ;;  %1943 = vmatmul.msk.f32.gmra.mxu1 %vm70_vm0, %v34_v32 }
  0x61   :  { %1912 = vmatmul.msk.f32.gmra.mxu0 %vm70_vm0, %v35_v34  ;;  %1944 = vmatmul.msk.f32.gmra.mxu1 %vm70_vm0, %v35_v34 }
  0x69   :  { %1913 = vmatmul.msk.f32.gmra.mxu0 %vm70_vm0, %v36_v39  ;;  %1945 = vmatmul.msk.f32.gmra.mxu1 %vm70_vm0, %v36_v39 }
  0x71   :  { %1914 = vmatmul.msk.f32.gmra.mxu0 %vm70_vm0, %v37_v48  ;;  %1946 = vmatmul.msk.f32.gmra.mxu1 %vm70_vm0, %v37_v48 }
  0x79   :  { %1915 = vmatmul.msk.f32.gmra.mxu0 %vm70_vm0, %v38_v54  ;;  %1947 = vmatmul.msk.f32.gmra.mxu1 %vm70_vm0, %v38_v54 }
  0x81   :  { %1916 = vmatmul.msk.f32.gmra.mxu0 %vm70_vm0, %v39_v55  ;;  %1948 = vmatmul.msk.f32.gmra.mxu1 %vm70_vm0, %v39_v55 }
  0x86   :  { %v2535_v56 = vpop.f32.mrf.mxu0  ;;  %v2537_v57 = vpop.f32.mrf.mxu1 }
  0x89   :  { %1917 = vmatmul.msk.f32.gmra.mxu0 %vm70_vm0, %v40_v58  ;;  %1949 = vmatmul.msk.f32.gmra.mxu1 %vm70_vm0, %v40_v58  ;;  %v49_v58 = vld [vmem:[%s4110_s0 + $0xc8] sm:$0xff] }
  0x8e   :  { %v187_v62 = vpop.f32.mrf.mxu0  ;;  %v300_v63 = vpop.f32.mrf.mxu1 }
  0x8f   :  { %v188_v1 = vadd.f32 %v187_v62, %v2547_v60  ;;  %v301_v2 = vadd.f32 %v300_v63, %v2549_v61 }
  0x91   :  { %1918 = vmatmul.msk.f32.gmra.mxu0 %vm70_vm0, %v41_v0  ;;  %1950 = vmatmul.msk.f32.gmra.mxu1 %vm70_vm0, %v41_v0  ;;  %v395_v3 = vmax.f32 %v188_v1, 0.0  ;;  %v396_v4 = vmax.f32 %v301_v2, 0.0 }
  0x93   :  { %512 = vmatmul.f32.vlgmr.msra.gmra.mxu2 %v395_v3  ;;  %625 = vmatmul.f32.vlgmr.msra.gmra.mxu3 %v396_v4  ;;  %v50_v3 = vld [vmem:[%s4110_s0 + $0xd0] sm:$0xff] }
  0x96   :  { %v190_v5 = vpop.f32.mrf.mxu0  ;;  %v303_v6 = vpop.f32.mrf.mxu1 }
  0x97   :  { %v191_v8 = vadd.f32 %v190_v5, %v2547_v60  ;;  %v304_v9 = vadd.f32 %v303_v6, %v2549_v61 }
  0x99   :  { %1919 = vmatmul.msk.f32.gmra.mxu0 %vm70_vm0, %v42_v7  ;;  %1951 = vmatmul.msk.f32.gmra.mxu1 %vm70_vm0, %v42_v7  ;;  %v397_v10 = vmax.f32 %v191_v8, 0.0  ;;  %v398_v11 = vmax.f32 %v304_v9, 0.0 }
  0x9b   :  { %515 = vmatmul.f32.gmra.mxu2 %v397_v10  ;;  %628 = vmatmul.f32.gmra.mxu3 %v398_v11  ;;  %v51_v10 = vld [vmem:[%s4110_s0 + $0xd8] sm:$0xff] }
  0x9e   :  { %v193_v12 = vpop.f32.mrf.mxu0  ;;  %v306_v13 = vpop.f32.mrf.mxu1 }
  0x9f   :  { %v194_v15 = vadd.f32 %v193_v12, %v2547_v60  ;;  %v307_v16 = vadd.f32 %v306_v13, %v2549_v61 }
  0xa1   :  { %1920 = vmatmul.msk.f32.gmra.mxu0 %vm70_vm0, %v43_v14  ;;  %1952 = vmatmul.msk.f32.gmra.mxu1 %vm70_vm0, %v43_v14  ;;  %v399_v17 = vmax.f32 %v194_v15, 0.0  ;;  %v400_v18 = vmax.f32 %v307_v16, 0.0 }
  0xa3   :  { %518 = vmatmul.f32.gmra.mxu2 %v399_v17  ;;  %631 = vmatmul.f32.gmra.mxu3 %v400_v18  ;;  %v52_v17 = vld [vmem:[%s4110_s0 + $0xe0] sm:$0xff] }
  0xa6   :  { %v196_v19 = vpop.f32.mrf.mxu0  ;;  %v309_v20 = vpop.f32.mrf.mxu1 }
  0xa7   :  { %v197_v22 = vadd.f32 %v196_v19, %v2547_v60  ;;  %v310_v23 = vadd.f32 %v309_v20, %v2549_v61 }
  0xa9   :  { %1921 = vmatmul.msk.f32.gmra.mxu0 %vm70_vm0, %v44_v21  ;;  %1953 = vmatmul.msk.f32.gmra.mxu1 %vm70_vm0, %v44_v21  ;;  %v401_v24 = vmax.f32 %v197_v22, 0.0  ;;  %v402_v25 = vmax.f32 %v310_v23, 0.0 }
  0xab   :  { %521 = vmatmul.f32.gmra.mxu2 %v401_v24  ;;  %634 = vmatmul.f32.gmra.mxu3 %v402_v25  ;;  %v53_v24 = vld [vmem:[%s4110_s0 + $0xe8] sm:$0xff] }
  0xae   :  { %v199_v26 = vpop.f32.mrf.mxu0  ;;  %v312_v27 = vpop.f32.mrf.mxu1 }
  0xaf   :  { %v200_v29 = vadd.f32 %v199_v26, %v2547_v60  ;;  %v313_v30 = vadd.f32 %v312_v27, %v2549_v61 }
  0xb1   :  { %1922 = vmatmul.msk.f32.gmra.mxu0 %vm70_vm0, %v45_v28  ;;  %1954 = vmatmul.msk.f32.gmra.mxu1 %vm70_vm0, %v45_v28  ;;  %v403_v31 = vmax.f32 %v200_v29, 0.0  ;;  %v404_v32 = vmax.f32 %v313_v30, 0.0 }
  0xb3   :  { %524 = vmatmul.f32.gmra.mxu2 %v403_v31  ;;  %637 = vmatmul.f32.gmra.mxu3 %v404_v32  ;;  %v54_v31 = vld [vmem:[%s4110_s0 + $0xf0] sm:$0xff] }
  0xb6   :  { %v202_v33 = vpop.f32.mrf.mxu0  ;;  %v315_v34 = vpop.f32.mrf.mxu1 }
  0xb7   :  { %v203_v36 = vadd.f32 %v202_v33, %v2547_v60  ;;  %v316_v37 = vadd.f32 %v315_v34, %v2549_v61 }
  0xb9   :  { %1923 = vmatmul.msk.f32.gmra.mxu0 %vm70_vm0, %v46_v35  ;;  %1955 = vmatmul.msk.f32.gmra.mxu1 %vm70_vm0, %v46_v35  ;;  %v405_v38 = vmax.f32 %v203_v36, 0.0  ;;  %v406_v39 = vmax.f32 %v316_v37, 0.0 }
  0xbb   :  { %527 = vmatmul.f32.gmra.mxu2 %v405_v38  ;;  %640 = vmatmul.f32.gmra.mxu3 %v406_v39  ;;  %v55_v38 = vld [vmem:[%s4110_s0 + $0xf8] sm:$0xff] }
  0xbe   :  { %v205_v40 = vpop.f32.mrf.mxu0  ;;  %v318_v41 = vpop.f32.mrf.mxu1 }
  0xbf   :  { %v206_v43 = vadd.f32 %v205_v40, %v2547_v60  ;;  %v319_v44 = vadd.f32 %v318_v41, %v2549_v61 }
  0xc1   :  { %1924 = vmatmul.msk.f32.gmra.mxu0 %vm70_vm0, %v47_v42  ;;  %1956 = vmatmul.msk.f32.gmra.mxu1 %vm70_vm0, %v47_v42  ;;  %v407_v45 = vmax.f32 %v206_v43, 0.0  ;;  %v408_v46 = vmax.f32 %v319_v44, 0.0  ;;  %v185_v43 = vadd.f32 %v2535_v56, %v2547_v60  ;;  %v298_v44 = vadd.f32 %v2537_v57, %v2549_v61 }
  0xc3   :  { %530 = vmatmul.f32.gmra.mxu2 %v407_v45  ;;  %643 = vmatmul.f32.gmra.mxu3 %v408_v46 }
  0xc6   :  { %v208_v47 = vpop.f32.mrf.mxu0  ;;  %v321_v48 = vpop.f32.mrf.mxu1 }
  0xc7   :  { %v209_v50 = vadd.f32 %v208_v47, %v2547_v60  ;;  %v322_v51 = vadd.f32 %v321_v48, %v2549_v61  ;;  %v393_v47 = vmax.f32 %v185_v43, 0.0  ;;  %v394_v48 = vmax.f32 %v298_v44, 0.0 }
  0xc9   :  { %1925 = vmatmul.msk.f32.gmra.mxu0 %vm70_vm0, %v48_v49  ;;  %1957 = vmatmul.msk.f32.gmra.mxu1 %vm70_vm0, %v48_v49  ;;  %v409_v52 = vmax.f32 %v209_v50, 0.0  ;;  %v410_v53 = vmax.f32 %v322_v51, 0.0 }
  0xcb   :  { %533 = vmatmul.f32.gmra.mxu2 %v409_v52  ;;  %646 = vmatmul.f32.gmra.mxu3 %v410_v53 }
  0xce   :  { %v211_v54 = vpop.f32.mrf.mxu0  ;;  %v324_v55 = vpop.f32.mrf.mxu1 }
  0xcf   :  { %v212_v59 = vadd.f32 %v211_v54, %v2547_v60  ;;  %v325_v62 = vadd.f32 %v324_v55, %v2549_v61 }
  0xd1   :  { %v411_v63 = vmax.f32 %v212_v59, 0.0  ;;  %v412_v0 = vmax.f32 %v325_v62, 0.0  ;;  %1926 = vmatmul.msk.f32.gmra.mxu0 %vm70_vm0, %v49_v58  ;;  %1958 = vmatmul.msk.f32.gmra.mxu1 %vm70_vm0, %v49_v58  ;;  %v2667_v59 = vld [vmem:[%s4115_s5] ss:$0 sm:$0xff] }
  0xd3   :  { %536 = vmatmul.f32.gmra.mxu2 %v411_v63  ;;  %649 = vmatmul.f32.gmra.mxu3 %v412_v0 }
  0xd6   :  { %v214_v1 = vpop.f32.mrf.mxu0  ;;  %v327_v2 = vpop.f32.mrf.mxu1 }
  0xd7   :  { %v215_v4 = vadd.f32 %v214_v1, %v2547_v60  ;;  %v328_v5 = vadd.f32 %v327_v2, %v2549_v61 }
  0xd9   :  { %v413_v6 = vmax.f32 %v215_v4, 0.0  ;;  %v414_v7 = vmax.f32 %v328_v5, 0.0  ;;  %1927 = vmatmul.msk.f32.gmra.mxu0 %vm70_vm0, %v50_v3  ;;  %1959 = vmatmul.msk.f32.gmra.mxu1 %vm70_vm0, %v50_v3 }
  0xdb   :  { %539 = vmatmul.f32.gmra.mxu2 %v413_v6  ;;  %652 = vmatmul.f32.gmra.mxu3 %v414_v7 }
  0xde   :  { %v217_v8 = vpop.f32.mrf.mxu0  ;;  %v330_v9 = vpop.f32.mrf.mxu1 }
  0xdf   :  { %v218_v11 = vadd.f32 %v217_v8, %v2547_v60  ;;  %v331_v12 = vadd.f32 %v330_v9, %v2549_v61 }
  0xe1   :  { %v415_v13 = vmax.f32 %v218_v11, 0.0  ;;  %v416_v14 = vmax.f32 %v331_v12, 0.0  ;;  %1928 = vmatmul.msk.f32.gmra.mxu0 %vm70_vm0, %v51_v10  ;;  %1960 = vmatmul.msk.f32.gmra.mxu1 %vm70_vm0, %v51_v10 }
  0xe3   :  { %542 = vmatmul.f32.gmra.mxu2 %v415_v13  ;;  %655 = vmatmul.f32.gmra.mxu3 %v416_v14 }
  0xe6   :  { %v220_v15 = vpop.f32.mrf.mxu0  ;;  %v333_v16 = vpop.f32.mrf.mxu1 }
  0xe7   :  { %v221_v18 = vadd.f32 %v220_v15, %v2547_v60  ;;  %v334_v19 = vadd.f32 %v333_v16, %v2549_v61 }
  0xe9   :  { %v417_v20 = vmax.f32 %v221_v18, 0.0  ;;  %v418_v21 = vmax.f32 %v334_v19, 0.0  ;;  %1929 = vmatmul.msk.f32.gmra.mxu0 %vm70_vm0, %v52_v17  ;;  %1961 = vmatmul.msk.f32.gmra.mxu1 %vm70_vm0, %v52_v17 }
  0xeb   :  { %545 = vmatmul.f32.gmra.mxu2 %v417_v20  ;;  %658 = vmatmul.f32.gmra.mxu3 %v418_v21 }
  0xee   :  { %v223_v22 = vpop.f32.mrf.mxu0  ;;  %v336_v23 = vpop.f32.mrf.mxu1 }
  0xef   :  { %v224_v25 = vadd.f32 %v223_v22, %v2547_v60  ;;  %v337_v26 = vadd.f32 %v336_v23, %v2549_v61 }
  0xf1   :  { %v419_v27 = vmax.f32 %v224_v25, 0.0  ;;  %v420_v28 = vmax.f32 %v337_v26, 0.0  ;;  %1930 = vmatmul.msk.f32.gmra.mxu0 %vm70_vm0, %v53_v24  ;;  %1962 = vmatmul.msk.f32.gmra.mxu1 %vm70_vm0, %v53_v24 }
  0xf3   :  { %548 = vmatmul.f32.gmra.mxu2 %v419_v27  ;;  %661 = vmatmul.f32.gmra.mxu3 %v420_v28 }
  0xf6   :  { %v226_v29 = vpop.f32.mrf.mxu0  ;;  %v339_v30 = vpop.f32.mrf.mxu1 }
  0xf7   :  { %v227_v32 = vadd.f32 %v226_v29, %v2547_v60  ;;  %v340_v33 = vadd.f32 %v339_v30, %v2549_v61 }
  0xf9   :  { %v421_v34 = vmax.f32 %v227_v32, 0.0  ;;  %v422_v35 = vmax.f32 %v340_v33, 0.0  ;;  %1931 = vmatmul.msk.f32.gmra.mxu0 %vm70_vm0, %v54_v31  ;;  %1963 = vmatmul.msk.f32.gmra.mxu1 %vm70_vm0, %v54_v31 }
  0xfb   :  { %551 = vmatmul.f32.gmra.mxu2 %v421_v34  ;;  %664 = vmatmul.f32.gmra.mxu3 %v422_v35 }
  0xfe   :  { %v229_v36 = vpop.f32.mrf.mxu0  ;;  %v342_v37 = vpop.f32.mrf.mxu1 }
  0xff   :  { %v230_v39 = vadd.f32 %v229_v36, %v2547_v60  ;;  %v343_v40 = vadd.f32 %v342_v37, %v2549_v61 }
 0x101   :  { %v423_v41 = vmax.f32 %v230_v39, 0.0  ;;  %v424_v42 = vmax.f32 %v343_v40, 0.0  ;;  %1932 = vmatmul.msk.f32.gmra.mxu0 %vm70_vm0, %v55_v38  ;;  %1964 = vmatmul.msk.f32.gmra.mxu1 %vm70_vm0, %v55_v38 }
 0x103   :  { %554 = vmatmul.f32.gmra.mxu2 %v423_v41  ;;  %667 = vmatmul.f32.gmra.mxu3 %v424_v42 }
 0x106   :  { %v232_v45 = vpop.f32.mrf.mxu0  ;;  %v345_v46 = vpop.f32.mrf.mxu1 }
 0x107   :  { %v233_v49 = vadd.f32 %v232_v45, %v2547_v60  ;;  %v346_v50 = vadd.f32 %v345_v46, %v2549_v61 }
 0x109   :  { %v425_v51 = vmax.f32 %v233_v49, 0.0  ;;  %v426_v52 = vmax.f32 %v346_v50, 0.0  ;;  %509 = vmatmul.f32.vlgmr.msrb.gmra.mxu0 %v393_v47  ;;  %622 = vmatmul.f32.vlgmr.msrb.gmra.mxu1 %v394_v48 }
 0x10b   :  { %557 = vmatmul.f32.gmra.mxu2 %v425_v51  ;;  %670 = vmatmul.f32.gmra.mxu3 %v426_v52 }
 0x10e   :  { %v235_v56 = vpop.f32.mrf.mxu0  ;;  %v348_v53 = vpop.f32.mrf.mxu1 }
 0x10f   :  { %v236_v57 = vadd.f32 %v235_v56, %v2547_v60  ;;  %v349_v54 = vadd.f32 %v348_v53, %v2549_v61 }
 0x111   :  { %v427_v55 = vmax.f32 %v236_v57, 0.0  ;;  %v428_v58 = vmax.f32 %v349_v54, 0.0 }
 0x113   :  { %560 = vmatmul.f32.gmra.mxu2 %v427_v55  ;;  %673 = vmatmul.f32.gmra.mxu3 %v428_v58 }
 0x116   :  { %v238_v62 = vpop.f32.mrf.mxu0  ;;  %v351_v63 = vpop.f32.mrf.mxu1 }
 0x117   :  { %v239_v0 = vadd.f32 %v238_v62, %v2547_v60  ;;  %v352_v1 = vadd.f32 %v351_v63, %v2549_v61  ;;  %v513_v2 = vpop.f32.mrf.mxu2  ;;  %v626_v3 = vpop.f32.mrf.mxu3 }
 0x118   :  { %v514_v4 = vadd.f32 %v2667_v59, %v513_v2 }
 0x119   :  { %v429_v5 = vmax.f32 %v239_v0, 0.0  ;;  %v430_v6 = vmax.f32 %v352_v1, 0.0 }
 0x11a   :  { %v2672_v7 = vadd.f32 %v626_v3, %v514_v4 }
 0x11b   :  { %563 = vmatmul.f32.gmra.mxu2 %v429_v5  ;;  %676 = vmatmul.f32.gmra.mxu3 %v430_v6 }
 0x11c   :  { %v720_v8 = vand.u32 2147483647, %v2672_v7  ;;  %vm912_vm1 = vcmp.ge.f32.partialorder %v2672_v7, 0.0 }
 0x11e   :  { %v752_v9 = vsub.f32 0.0, %v720_v8  ;;  %v241_v10 = vpop.f32.mrf.mxu0  ;;  %v354_v11 = vpop.f32.mrf.mxu1 }
 0x11f   :  { %v242_v12 = vadd.f32 %v241_v10, %v2547_v60  ;;  %v355_v13 = vadd.f32 %v354_v11, %v2549_v61  ;;  %v516_v14 = vpop.f32.mrf.mxu2  ;;  %v629_v15 = vpop.f32.mrf.mxu3 }
 0x120   :  { %v785_v16 = vmul.f32 1.442695, %v752_v9  ;;  %v517_v17 = vadd.f32 %v2667_v59, %v516_v14 }
 0x121   :  { %v431_v18 = vmax.f32 %v242_v12, 0.0  ;;  %v432_v19 = vmax.f32 %v355_v13, 0.0 }
 0x122   :  { %2076 = vpow2.f32 %v785_v16  ;;  %v2678_v20 = vadd.f32 %v629_v15, %v517_v17 }
 0x123   :  { %566 = vmatmul.f32.gmra.mxu2 %v431_v18  ;;  %679 = vmatmul.f32.gmra.mxu3 %v432_v19 }
 0x124   :  { %v721_v21 = vand.u32 2147483647, %v2678_v20  ;;  %vm913_vm3 = vcmp.ge.f32.partialorder %v2678_v20, 0.0 }
 0x126   :  { %v753_v22 = vsub.f32 0.0, %v721_v21  ;;  %v244_v23 = vpop.f32.mrf.mxu0  ;;  %v357_v24 = vpop.f32.mrf.mxu1 }
 0x127   :  { %v245_v25 = vadd.f32 %v244_v23, %v2547_v60  ;;  %v358_v26 = vadd.f32 %v357_v24, %v2549_v61  ;;  %v519_v27 = vpop.f32.mrf.mxu2  ;;  %v632_v28 = vpop.f32.mrf.mxu3 }
 0x128   :  { %v2683_v29 = vpop.eup %2076  ;;  %v787_v30 = vmul.f32 1.442695, %v753_v22  ;;  %v520_v31 = vadd.f32 %v2667_v59, %v519_v27 }
 0x129   :  { %v433_v32 = vmax.f32 %v245_v25, 0.0  ;;  %v434_v33 = vmax.f32 %v358_v26, 0.0  ;;  %v848_v34 = vadd.f32 1.0, %v2683_v29  ;;  %v1115_v6 = vmul.f32 -0.5, %v2683_v29 }
 0x12a   :  { %2078 = vpow2.f32 %v787_v30  ;;  %v2687_v35 = vadd.f32 %v632_v28, %v520_v31  ;;  %v1118_v18 = vand.u32 2147483647, %v2683_v29 }
 0x12b   :  { %569 = vmatmul.f32.gmra.mxu2 %v433_v32  ;;  %682 = vmatmul.f32.gmra.mxu3 %v434_v33  ;;  %2080 = vrcp.f32 %v848_v34  ;;  %v1116_v13 = vadd.f32 1.0, %v1115_v6 }
 0x12c   :  { %v722_v36 = vand.u32 2147483647, %v2687_v35  ;;  %2082 = vlog2.f32 %v848_v34  ;;  %vm1119_vm2 = vcmp.lt.f32.partialorder %v1118_v18, 0.0004427343  ;;  %vm914_vm6 = vcmp.ge.f32.partialorder %v2687_v35, 0.0 }
 0x12d   :  { %v1117_v32 = vmul.f32 %v2683_v29, %v1116_v13 }
 0x12e   :  { %v754_v37 = vsub.f32 0.0, %v722_v36  ;;  %v247_v38 = vpop.f32.mrf.mxu0  ;;  %v360_v39 = vpop.f32.mrf.mxu1 }
 0x12f   :  { %v248_v40 = vadd.f32 %v247_v38, %v2547_v60  ;;  %v361_v41 = vadd.f32 %v360_v39, %v2549_v61  ;;  %v522_v42 = vpop.f32.mrf.mxu2  ;;  %v635_v43 = vpop.f32.mrf.mxu3  ;;  %v1072_v38 = vmax.f32 %v2672_v7, 0.0 }
 0x130   :  { %v2692_v44 = vpop.eup %2078  ;;  %v523_v45 = vadd.f32 %v2667_v59, %v522_v42  ;;  %v789_v49 = vmul.f32 1.442695, %v754_v37 }
 0x131   :  { %v2081_v46 = vpop.eup %2080  ;;  %v435_v47 = vmax.f32 %v248_v40, 0.0  ;;  %v436_v48 = vmax.f32 %v361_v41, 0.0  ;;  %v849_v56 = vadd.f32 1.0, %v2692_v44 }
 0x132   :  { %v2695_v50 = vadd.f32 %v635_v43, %v523_v45  ;;  %v944_v51 = vmul.f32 %v2081_v46, %v2683_v29  ;;  %2084 = vpow2.f32 %v789_v49  ;;  %v2083_v9 = vpop.eup %2082  ;;  %v1124_v43 = vmul.f32 -0.5, %v2692_v44 }
 0x133   :  { %572 = vmatmul.f32.gmra.mxu2 %v435_v47  ;;  %685 = vmatmul.f32.gmra.mxu3 %v436_v48  ;;  %2086 = vrcp.f32 %v849_v56  ;;  %v1114_v24 = vmul.f32 0.6931472, %v2083_v9 }
 0x134   :  { %v723_v52 = vand.u32 2147483647, %v2695_v50  ;;  %v976_v53 = vsel %vm912_vm1, %v2081_v46, %v944_v51  ;;  %vm915_vm8 = vcmp.ge.f32.partialorder %v2695_v50, 0.0 }
 0x135   :  { %v1008_v2 = vmax.f32 %v976_v53, 0.0  ;;  %v1120_v37 = vsel %vm1119_vm2, %v1117_v32, %v1114_v24 }
 0x136   :  { %v755_v57 = vsub.f32 0.0, %v723_v52  ;;  %v250_v54 = vpop.f32.mrf.mxu0  ;;  %v363_v55 = vpop.f32.mrf.mxu1  ;;  %v2730_v42 = vadd.f32 %v1120_v37, %v1072_v38 }
 0x137   :  { %v251_v58 = vadd.f32 %v250_v54, %v2547_v60  ;;  %v364_v62 = vadd.f32 %v363_v55, %v2549_v61  ;;  %v525_v63 = vpop.f32.mrf.mxu2  ;;  %v638_v0 = vpop.f32.mrf.mxu3  ;;  %v2710_v12 = vmin.f32 %v1008_v2, 1.0 }
 0x138   :  { %v526_v1 = vadd.f32 %v2667_v59, %v525_v63  ;;  %v791_v3 = vmul.f32 1.442695, %v755_v57  ;;  %v2707_v10 = vpop.eup %2084  ;;  %v1127_v63 = vand.u32 2147483647, %v2692_v44 }
 0x139   :  { %v437_v4 = vmax.f32 %v251_v58, 0.0  ;;  %v438_v5 = vmax.f32 %v364_v62, 0.0  ;;  %v2087_v14 = vpop.eup %2086  ;;  %v850_v25 = vadd.f32 1.0, %v2707_v10  ;;  %v2719_v28 = vmul.f32 %v2710_v12, %v2672_v7 }
 0x13a   :  { %v2705_v8 = vadd.f32 %v638_v0, %v526_v1  ;;  %2088 = vpow2.f32 %v791_v3  ;;  %v945_v33 = vmul.f32 %v2087_v14, %v2692_v44  ;;  %v1125_v1 = vadd.f32 1.0, %v1124_v43 }
 0x13b   :  { %575 = vmatmul.f32.gmra.mxu2 %v437_v4  ;;  %688 = vmatmul.f32.gmra.mxu3 %v438_v5  ;;  %4169 = vst [vmem:[#allocation5_spill] sm:$0xff] %v2719_v28  ;;  %v1133_v9 = vmul.f32 -0.5, %v2707_v10  ;;  %vm2757_vm5 = vcmp.lt.f32.partialorder %v1127_v63, 0.0004427343 }
 0x13c   :  { %v724_v11 = vand.u32 2147483647, %v2705_v8  ;;  %v977_v40 = vsel %vm913_vm3, %v2087_v14, %v945_v33  ;;  %vm916_vm11 = vcmp.ge.f32.partialorder %v2705_v8, 0.0 }
 0x13d   :  { %v1009_v53 = vmax.f32 %v977_v40, 0.0  ;;  %v1073_v40 = vmax.f32 %v2678_v20, 0.0 }
 0x13e   :  { %v756_v15 = vsub.f32 0.0, %v724_v11  ;;  %v253_v16 = vpop.f32.mrf.mxu0  ;;  %v366_v17 = vpop.f32.mrf.mxu1 }
 0x13f   :  { %v254_v19 = vadd.f32 %v253_v16, %v2547_v60  ;;  %v367_v21 = vadd.f32 %v366_v17, %v2549_v61  ;;  %v528_v22 = vpop.f32.mrf.mxu2  ;;  %v641_v23 = vpop.f32.mrf.mxu3  ;;  %v1041_v5 = vmin.f32 %v1009_v53, 1.0  ;;  %v4117_v16 = vmov 0.0  }
 0x140   :  { %v793_v26 = vmul.f32 1.442695, %v756_v15  ;;  %v529_v27 = vadd.f32 %v2667_v59, %v528_v22  ;;  %v2725_v36 = vpop.eup %2088 }
 0x141   :  { %v439_v30 = vmax.f32 %v254_v19, 0.0  ;;  %v440_v31 = vmax.f32 %v367_v21, 0.0  ;;  %v2734_v45 = vadd.f32 1.0, %v2725_v36  ;;  %v1126_v19 = vmul.f32 %v2692_v44, %v1125_v1 }
 0x142   :  { %2090 = vpow2.f32 %v793_v26  ;;  %v2723_v34 = vadd.f32 %v641_v23, %v529_v27  ;;  %v1136_v26 = vand.u32 2147483647, %v2707_v10  ;;  %v2777_v32 = vmul.f32 %v1041_v5, %v2678_v20 }
 0x143   :  { %578 = vmatmul.f32.gmra.mxu2 %v439_v30  ;;  %691 = vmatmul.f32.gmra.mxu3 %v440_v31  ;;  %2092 = vrcp.f32 %v850_v25  ;;  %v1425_v30 = vld [vmem:[%s4111_s1 + $0x10] sm:$0xff]  ;;  %v1134_v31 = vadd.f32 1.0, %v1133_v9 }
 0x144   :  { %v725_v39 = vand.u32 2147483647, %v2723_v34  ;;  %2094 = vlog2.f32 %v849_v56  ;;  %v1424_v56 = vld [vmem:[%s4111_s1 + $0x8] sm:$0xff]  ;;  %4172 = vst [vmem:[#allocation6_spill] sm:$0xff] %v2777_v32  ;;  %vm1457_vm7 = vcmp.lt.f32.partialorder %v1425_v30, %v1041_v5  ;;  %vm2796_vm9 = vcmp.lt.f32.partialorder %v1136_v26, 0.0004427343 }
 0x145   :  { %2096 = vrcp.f32 %v2734_v45  ;;  %vm1456_vm4 = vcmp.lt.f32.partialorder %v1424_v56, %v2710_v12  ;;  %vm917_vm13 = vcmp.ge.f32.partialorder %v2723_v34, 0.0 }
 0x146   :  { %v256_v29 = vpop.f32.mrf.mxu0  ;;  %v369_v41 = vpop.f32.mrf.mxu1  ;;  %v757_v55 = vsub.f32 0.0, %v725_v39  ;;  %2098 = vlog2.f32 %v850_v25  ;;  %v2763_v17 = vsel %vm1456_vm4, 1.0, %v4117_v16 }
 0x147   :  { %v257_v46 = vadd.f32 %v256_v29, %v2547_v60  ;;  %v370_v47 = vadd.f32 %v369_v41, %v2549_v61  ;;  %v531_v48 = vpop.f32.mrf.mxu2  ;;  %v644_v49 = vpop.f32.mrf.mxu3 }
 0x148   :  { %v2738_v51 = vpop.eup %2090  ;;  %v532_v52 = vadd.f32 %v2667_v59, %v531_v48  ;;  %v795_v11 = vmul.f32 1.442695, %v757_v55 }
 0x149   :  { %v2093_v54 = vpop.eup %2092  ;;  %v441_v58 = vmax.f32 %v257_v46, 0.0  ;;  %v442_v62 = vmax.f32 %v370_v47, 0.0  ;;  %v2752_v3 = vadd.f32 1.0, %v2738_v51  ;;  %v1074_v46 = vmax.f32 %v2687_v35, 0.0 }
 0x14a   :  { %v2747_v0 = vadd.f32 %v644_v49, %v532_v52  ;;  %v2095_v2 = vpop.eup %2094  ;;  %v946_v6 = vmul.f32 %v2093_v54, %v2707_v10  ;;  %v2789_v49 = vmul.f32 %v2763_v17, %v2672_v7  ;;  %v1075_v52 = vmax.f32 %v2695_v50, 0.0 }
 0x14b   :  { %581 = vmatmul.f32.gmra.mxu2 %v441_v58  ;;  %694 = vmatmul.f32.gmra.mxu3 %v442_v62  ;;  %v1123_v18 = vmul.f32 0.6931472, %v2095_v2  ;;  %2100 = vrcp.f32 %v2752_v3  ;;  %v2097_v25 = vpop.eup %2096  ;;  %v2802_v7 = vsel %vm1457_vm7, 1.0, %v4117_v16 }
 0x14c   :  { %v726_v4 = vand.u32 2147483647, %v2747_v0  ;;  %v978_v44 = vsel %vm914_vm6, %v2093_v54, %v946_v6  ;;  %2102 = vpow2.f32 %v795_v11  ;;  %v2099_v41 = vpop.eup %2098  ;;  %v947_v47 = vmul.f32 %v2097_v25, %v2725_v36 }
 0x14d   :  { %v1129_v29 = vsel %vm2757_vm5, %v1126_v19, %v1123_v18  ;;  %v1010_v43 = vmax.f32 %v978_v44, 0.0  ;;  %v1135_v54 = vmul.f32 %v2707_v10, %v1134_v31  ;;  %v1132_v1 = vmul.f32 0.6931472, %v2099_v41 }
 0x14e   :  { %v758_v14 = vsub.f32 0.0, %v726_v4  ;;  %v259_v12 = vpop.f32.mrf.mxu0  ;;  %v372_v15 = vpop.f32.mrf.mxu1  ;;  %v2793_v53 = vadd.f32 %v1129_v29, %v1073_v40  ;;  %v979_v13 = vsel %vm915_vm8, %v2097_v25, %v947_v47  ;;  %v1145_v31 = vand.u32 2147483647, %v2725_v36 }
 0x14f   :  { %v260_v21 = vadd.f32 %v259_v12, %v2547_v60  ;;  %v373_v22 = vadd.f32 %v372_v15, %v2549_v61  ;;  %v534_v23 = vpop.f32.mrf.mxu2  ;;  %v647_v24 = vpop.f32.mrf.mxu3  ;;  %v1042_v11 = vmin.f32 %v1010_v43, 1.0  ;;  %v1426_v12 = vld [vmem:[%s4111_s1 + $0x18] sm:$0xff]  ;;  %v1138_v26 = vsel %vm2796_vm9, %v1135_v54, %v1132_v1 }
 0x150   :  { %v535_v27 = vadd.f32 %v2667_v59, %v534_v23  ;;  %v797_v33 = vmul.f32 1.442695, %v758_v14  ;;  %v2838_v40 = vadd.f32 %v1138_v26, %v1074_v46  ;;  %vm2852_vm12 = vcmp.lt.f32.partialorder %v1145_v31, 0.0004427343 }
 0x151   :  { %v443_v37 = vmax.f32 %v260_v21, 0.0  ;;  %v444_v38 = vmax.f32 %v373_v22, 0.0  ;;  %v2101_v56 = vpop.eup %2100  ;;  %v2820_v21 = vmul.f32 %v2802_v7, %v2678_v20  ;;  %v1142_v22 = vmul.f32 -0.5, %v2725_v36 }
 0x152   :  { %v2779_v39 = vadd.f32 %v647_v24, %v535_v27  ;;  %2104 = vpow2.f32 %v797_v33  ;;  %v2805_v2 = vpop.eup %2102  ;;  %vm1458_vm10 = vcmp.lt.f32.partialorder %v1426_v12, %v1042_v11  ;;  %v1011_v20 = vmax.f32 %v979_v13, 0.0  ;;  %4177 = vst [vmem:[#allocation9_spill] sm:$0xff] %v2838_v40 }
 0x153   :  { %584 = vmatmul.f32.gmra.mxu2 %v443_v37  ;;  %697 = vmatmul.f32.gmra.mxu3 %v444_v38  ;;  %2106 = vlog2.f32 %v2734_v45  ;;  %v948_v45 = vmul.f32 %v2101_v56, %v2738_v51  ;;  %v853_v25 = vadd.f32 1.0, %v2805_v2  ;;  %v1076_v37 = vmax.f32 %v2705_v8, 0.0 }
 0x154   :  { %4173 = vst [vmem:[#allocation7_spill] sm:$0xff] %v2779_v39  ;;  %v727_v48 = vand.u32 2147483647, %v2779_v39  ;;  %v1143_v29 = vadd.f32 1.0, %v1142_v22  ;;  %vm918_vm1 = vcmp.ge.f32.partialorder %v2747_v0, 0.0  ;;  %vm919_vm3 = vcmp.ge.f32.partialorder %v2779_v39, 0.0 }
 0x155   :  { %v980_v33 = vsel %vm916_vm11, %v2101_v56, %v948_v45 }
 0x156   :  { %v759_v58 = vsub.f32 0.0, %v727_v48  ;;  %v262_v62 = vpop.f32.mrf.mxu0  ;;  %v375_v63 = vpop.f32.mrf.mxu1  ;;  %v2842_v48 = vsel %vm1458_vm10, 1.0, %v4117_v16 }
 0x157   :  { %v263_v4 = vadd.f32 %v262_v62, %v2547_v60  ;;  %v376_v10 = vadd.f32 %v375_v63, %v2549_v61  ;;  %v537_v6 = vpop.f32.mrf.mxu2  ;;  %v650_v9 = vpop.f32.mrf.mxu3  ;;  %v2849_v62 = vmin.f32 %v1011_v20, 1.0  ;;  %v1012_v63 = vmax.f32 %v980_v33, 0.0 }
 0x158   :  { %v799_v14 = vmul.f32 1.442695, %v759_v58  ;;  %v538_v5 = vadd.f32 %v2667_v59, %v537_v6  ;;  %v2830_v27 = vpop.eup %2104  ;;  %v2860_v6 = vmul.f32 %v1042_v11, %v2687_v35  ;;  %v1144_v11 = vmul.f32 %v2725_v36, %v1143_v29 }
 0x159   :  { %v445_v18 = vmax.f32 %v263_v4, 0.0  ;;  %v446_v19 = vmax.f32 %v376_v10, 0.0  ;;  %v2107_v30 = vpop.eup %2106  ;;  %v2845_v54 = vadd.f32 1.0, %v2830_v27  ;;  %v1427_v10 = vld [vmem:[%s4111_s1 + $0x20] sm:$0xff]  ;;  %v2875_v22 = vmin.f32 %v1012_v63, 1.0 }
 0x15a   :  { %v2823_v23 = vadd.f32 %v650_v9, %v538_v5  ;;  %2108 = vpow2.f32 %v799_v14  ;;  %4180 = vst [vmem:[#allocation10_spill] sm:$0xff] %v2860_v6  ;;  %v2866_v5 = vmul.f32 %v2842_v48, %v2687_v35  ;;  %v1141_v12 = vmul.f32 0.6931472, %v2107_v30  ;;  %v1428_v35 = vld [vmem:[%s4111_s1 + $0x28] sm:$0xff] }
 0x15b   :  { %587 = vmatmul.f32.gmra.mxu2 %v445_v18  ;;  %700 = vmatmul.f32.gmra.mxu3 %v446_v19  ;;  %2110 = vlog2.f32 %v2752_v3  ;;  %v1151_v18 = vmul.f32 -0.5, %v2738_v51  ;;  %vm1459_vm14 = vcmp.lt.f32.partialorder %v1427_v10, %v2849_v62  ;;  %v1154_v30 = vand.u32 2147483647, %v2738_v51 }
 0x15c   :  { %4176 = vst [vmem:[#allocation8_spill] sm:$0xff] %v2823_v23  ;;  %v728_v44 = vand.u32 2147483647, %v2823_v23  ;;  %2112 = vrcp.f32 %v853_v25  ;;  %v1147_v33 = vsel %vm2852_vm12, %v1144_v11, %v1141_v12  ;;  %v1160_v29 = vmul.f32 -0.5, %v2805_v2 }
 0x15d   :  { %2114 = vrcp.f32 %v2845_v54  ;;  %vm1460_vm15 = vcmp.lt.f32.partialorder %v1428_v35, %v2875_v22  ;;  %v2911_v35 = vadd.f32 %v1147_v33, %v1075_v52  ;;  %vm2917_vm0 = vcmp.lt.f32.partialorder %v1154_v30, 0.0004427343 }
 0x15e   :  { %v760_v41 = vsub.f32 0.0, %v728_v44  ;;  %v265_v43 = vpop.f32.mrf.mxu0  ;;  %v378_v47 = vpop.f32.mrf.mxu1  ;;  %v1077_v44 = vmax.f32 %v2723_v34, 0.0  ;;  %vm920_vm6 = vcmp.ge.f32.partialorder %v2823_v23, 0.0 }
 0x15f   :  { %v266_v56 = vadd.f32 %v265_v43, %v2547_v60  ;;  %v379_v55 = vadd.f32 %v378_v47, %v2549_v61  ;;  %v540_v58 = vpop.f32.mrf.mxu2  ;;  %v653_v46 = vpop.f32.mrf.mxu3  ;;  %4183 = vst [vmem:[#allocation13_spill] sm:$0xff] %v2911_v35 }
 0x160   :  { %v801_v3 = vmul.f32 1.442695, %v760_v41  ;;  %v541_v1 = vadd.f32 %v2667_v59, %v540_v58  ;;  %v2862_v9 = vpop.eup %2108  ;;  %v1152_v58 = vadd.f32 1.0, %v1151_v18 }
 0x161   :  { %v447_v13 = vmax.f32 %v266_v56, 0.0  ;;  %v448_v14 = vmax.f32 %v379_v55, 0.0  ;;  %v2111_v19 = vpop.eup %2110  ;;  %v2884_v31 = vadd.f32 1.0, %v2862_v9  ;;  %v2892_v56 = vsel %vm1459_vm14, 1.0, %v4117_v16 }
 0x162   :  { %v2868_v45 = vadd.f32 %v653_v46, %v541_v1  ;;  %2116 = vpow2.f32 %v801_v3  ;;  %v2113_v26 = vpop.eup %2112  ;;  %v2894_v55 = vmul.f32 0.6931472, %v2111_v19 }
 0x163   :  { %590 = vmatmul.f32.gmra.mxu2 %v447_v13  ;;  %703 = vmatmul.f32.gmra.mxu3 %v448_v14  ;;  %2118 = vlog2.f32 %v853_v25  ;;  %v949_v25 = vmul.f32 %v2113_v26, %v2805_v2  ;;  %v2115_v4 = vpop.eup %2114  ;;  %v1163_v13 = vand.u32 2147483647, %v2805_v2 }
 0x164   :  { %4181 = vst [vmem:[#allocation11_spill] sm:$0xff] %v2868_v45  ;;  %v729_v20 = vand.u32 2147483647, %v2868_v45  ;;  %2120 = vrcp.f32 %v2884_v31  ;;  %v950_v52 = vmul.f32 %v2115_v4, %v2830_v27  ;;  %vm921_vm10 = vcmp.ge.f32.partialorder %v2868_v45, 0.0 }
 0x165   :  { %vm2941_vm2 = vcmp.lt.f32.partialorder %v1163_v13, 0.0004427343 }
 0x166   :  { %v761_v41 = vsub.f32 0.0, %v729_v20  ;;  %v268_v43 = vpop.f32.mrf.mxu0  ;;  %v381_v47 = vpop.f32.mrf.mxu1  ;;  %v1161_v20 = vadd.f32 1.0, %v1160_v29  ;;  %v981_v29 = vsel %vm917_vm13, %v2113_v26, %v949_v25 }
 0x167   :  { %v269_v46 = vadd.f32 %v268_v43, %v2547_v60  ;;  %v382_v63 = vadd.f32 %v381_v47, %v2549_v61  ;;  %v543_v3 = vpop.f32.mrf.mxu2  ;;  %v656_v1 = vpop.f32.mrf.mxu3  ;;  %v1153_v47 = vmul.f32 %v2738_v51, %v1152_v58  ;;  %v2928_v51 = vmul.f32 %v2892_v56, %v2695_v50 }
 0x168   :  { %v544_v10 = vadd.f32 %v2667_v59, %v543_v3  ;;  %v2905_v12 = vpop.eup %2116  ;;  %v803_v18 = vmul.f32 1.442695, %v761_v41  ;;  %v2915_v3 = vsel %vm1460_vm15, 1.0, %v4117_v16  ;;  %v1162_v58 = vmul.f32 %v2805_v2, %v1161_v20 }
 0x169   :  { %v449_v19 = vmax.f32 %v269_v46, 0.0  ;;  %v450_v11 = vmax.f32 %v382_v63, 0.0  ;;  %v2119_v15 = vpop.eup %2118  ;;  %v1156_v30 = vsel %vm2917_vm0, %v1153_v47, %v2894_v55  ;;  %v2934_v41 = vadd.f32 1.0, %v2905_v12 }
 0x16a   :  { %v2907_v43 = vadd.f32 %v656_v1, %v544_v10  ;;  %2122 = vpow2.f32 %v803_v18  ;;  %v2938_v26 = vmul.f32 %v2915_v3, %v2705_v8  ;;  %v2121_v63 = vpop.eup %2120  ;;  %v1013_v14 = vmax.f32 %v981_v29, 0.0 }
 0x16b   :  { %593 = vmatmul.f32.gmra.mxu2 %v449_v19  ;;  %706 = vmatmul.f32.gmra.mxu3 %v450_v11  ;;  %v1159_v55 = vmul.f32 0.6931472, %v2119_v15  ;;  %v1169_v19 = vmul.f32 -0.5, %v2830_v27  ;;  %v982_v2 = vsel %vm918_vm1, %v2115_v4, %v950_v52  ;;  %2124 = vlog2.f32 %v2845_v54 }
 0x16c   :  { %4182 = vst [vmem:[#allocation12_spill] sm:$0xff] %v2907_v43  ;;  %v730_v33 = vand.u32 2147483647, %v2907_v43  ;;  %2126 = vrcp.f32 %v2934_v41  ;;  %v2955_v15 = vmul.f32 %v2849_v62, %v2695_v50  ;;  %v2961_v4 = vmin.f32 %v1013_v14, 1.0 }
 0x16d   :  { %v1165_v54 = vsel %vm2941_vm2, %v1162_v58, %v1159_v55  ;;  %v2971_v62 = vadd.f32 %v1156_v30, %v1076_v37  ;;  %vm922_vm12 = vcmp.ge.f32.partialorder %v2907_v43, 0.0 }
 0x16e   :  { %v762_v1 = vsub.f32 0.0, %v730_v33  ;;  %v271_v25 = vpop.f32.mrf.mxu0  ;;  %v384_v10 = vpop.f32.mrf.mxu1  ;;  %4188 = vst [vmem:[#allocation14_spill] sm:$0xff] %v2955_v15  ;;  %v2985_v30 = vadd.f32 %v1165_v54, %v1077_v44  ;;  %v1190_v15 = vand.u32 2147483647, %v2905_v12 }
 0x16f   :  { %v272_v18 = vadd.f32 %v271_v25, %v2547_v60  ;;  %v385_v11 = vadd.f32 %v384_v10, %v2549_v61  ;;  %v546_v47 = vpop.f32.mrf.mxu2  ;;  %v659_v57 = vpop.f32.mrf.mxu3  ;;  %v1172_v25 = vand.u32 2147483647, %v2830_v27  ;;  %v951_v10 = vmul.f32 %v2121_v63, %v2862_v9  ;;  %4190 = vst [vmem:[#allocation16_spill] sm:$0xff] %v2971_v62 }
 0x170   :  { %v805_v13 = vmul.f32 1.442695, %v762_v1  ;;  %v547_v20 = vadd.f32 %v2667_v59, %v546_v47  ;;  %v2965_v52 = vpop.eup %2122  ;;  %v1014_v1 = vmax.f32 %v982_v2, 0.0  ;;  %4191 = vst [vmem:[#allocation17_spill] sm:$0xff] %v2985_v30  ;;  %vm3089_vm11 = vcmp.lt.f32.partialorder %v1190_v15, 0.0004427343 }
 0x171   :  { %v451_v29 = vmax.f32 %v272_v18, 0.0  ;;  %v452_v33 = vmax.f32 %v385_v11, 0.0  ;;  %v2125_v55 = vpop.eup %2124  ;;  %v1170_v18 = vadd.f32 1.0, %v1169_v19  ;;  %v983_v11 = vsel %vm919_vm3, %v2121_v63, %v951_v10 }
 0x172   :  { %2128 = vpow2.f32 %v805_v13  ;;  %v2959_v36 = vadd.f32 %v659_v57, %v547_v20  ;;  %v1429_v57 = vld [vmem:[%s4111_s1 + $0x30] sm:$0xff]  ;;  %v2127_v47 = vpop.eup %2126  ;;  %vm2988_vm5 = vcmp.lt.f32.partialorder %v1172_v25, 0.0004427343  ;;  %v2997_v63 = vmin.f32 %v1014_v1, 1.0 }
 0x173   :  { %596 = vmatmul.f32.gmra.mxu2 %v451_v29  ;;  %709 = vmatmul.f32.gmra.mxu3 %v452_v33  ;;  %2130 = vlog2.f32 %v2884_v31  ;;  %vm1461_vm4 = vcmp.lt.f32.partialorder %v1429_v57, %v2961_v4  ;;  %v2993_v31 = vadd.f32 1.0, %v2965_v52  ;;  %v1178_v10 = vmul.f32 -0.5, %v2862_v9 }
 0x174   :  { %4189 = vst [vmem:[#allocation15_spill] sm:$0xff] %v2959_v36  ;;  %v731_v58 = vand.u32 2147483647, %v2959_v36  ;;  %v1015_v50 = vmax.f32 %v983_v11, 0.0  ;;  %v952_v1 = vmul.f32 %v2127_v47, %v2905_v12  ;;  %v1181_v11 = vand.u32 2147483647, %v2862_v9 }
 0x175   :  { %2132 = vrcp.f32 %v2993_v31  ;;  %v1171_v38 = vmul.f32 %v2830_v27, %v1170_v18  ;;  %v1187_v18 = vmul.f32 -0.5, %v2905_v12  ;;  %vm923_vm15 = vcmp.ge.f32.partialorder %v2959_v36, 0.0 }
 0x176   :  { %v763_v2 = vsub.f32 0.0, %v731_v58  ;;  %v274_v13 = vpop.f32.mrf.mxu0  ;;  %v387_v20 = vpop.f32.mrf.mxu1  ;;  %vm3038_vm8 = vcmp.lt.f32.partialorder %v1181_v11, 0.0004427343 }
 0x177   :  { %v275_v33 = vadd.f32 %v274_v13, %v2547_v60  ;;  %v388_v44 = vadd.f32 %v387_v20, %v2549_v61  ;;  %v549_v54 = vpop.f32.mrf.mxu2  ;;  %v662_v19 = vpop.f32.mrf.mxu3  ;;  %v1430_v13 = vld [vmem:[%s4111_s1 + $0x38] sm:$0xff] }
 0x178   :  { %v3000_v58 = vpop.eup %2128  ;;  %v807_v37 = vmul.f32 1.442695, %v763_v2  ;;  %v550_v25 = vadd.f32 %v2667_v59, %v549_v54  ;;  %v1168_v2 = vmul.f32 0.6931472, %v2125_v55  ;;  %v1179_v54 = vadd.f32 1.0, %v1178_v10 }
 0x179   :  { %v453_v24 = vmax.f32 %v275_v33, 0.0  ;;  %v454_v46 = vmax.f32 %v388_v44, 0.0  ;;  %v3010_v20 = vadd.f32 1.0, %v3000_v58  ;;  %v2131_v14 = vpop.eup %2130  ;;  %v4195_v33 = vmov 0.0  }
 0x17a   :  { %v3012_v16 = vadd.f32 %v662_v19, %v550_v25  ;;  %2134 = vpow2.f32 %v807_v37  ;;  %v3019_v44 = vsel %vm1461_vm4, 1.0, %v4195_v33  ;;  %vm1462_vm7 = vcmp.lt.f32.partialorder %v1430_v13, %v2997_v63 }
 0x17b   :  { %599 = vmatmul.f32.gmra.mxu2 %v453_v24  ;;  %712 = vmatmul.f32.gmra.mxu3 %v454_v46  ;;  %v3024_v55 = vmin.f32 %v1015_v50, 1.0  ;;  %2136 = vrcp.f32 %v3010_v20  ;;  %v1177_v19 = vmul.f32 0.6931472, %v2131_v14  ;;  %v1431_v24 = vld [vmem:[%s4111_s1 + $0x40] sm:$0xff]  ;;  %v984_v46 = vsel %vm920_vm6, %v2127_v47, %v952_v1 }
 0x17c   :  { %4194 = vst [vmem:[#allocation18_spill] sm:$0xff] %v3012_v16  ;;  %2138 = vlog2.f32 %v2934_v41  ;;  %v3034_v27 = vmul.f32 %v3019_v44, %v2723_v34  ;;  %v1174_v50 = vsel %vm2988_vm5, %v1171_v38, %v1168_v2  ;;  %v3048_v57 = vsel %vm1462_vm7, 1.0, %v4195_v33  ;;  %v2133_v38 = vpop.eup %2132 }
 0x17d   :  { %4196 = vst [vmem:[#allocation19_spill] sm:$0xff] %v3024_v55  ;;  %v1180_v29 = vmul.f32 %v2862_v9, %v1179_v54  ;;  %vm1463_vm9 = vcmp.lt.f32.partialorder %v1431_v24, %v3024_v55  ;;  %v1016_v11 = vmax.f32 %v984_v46, 0.0  ;;  %v4200_v54 = vmax.f32 %v2747_v0, 0.0 }
 0x17e   :  { %v277_v37 = vpop.f32.mrf.mxu0  ;;  %v390_v10 = vpop.f32.mrf.mxu1  ;;  %4199 = vst [vmem:[#allocation20_spill] sm:$0xff] %v3048_v57  ;;  %v953_v14 = vmul.f32 %v2133_v38, %v2965_v52  ;;  %2140 = vlog2.f32 %v2993_v31  ;;  %v1196_v9 = vmul.f32 -0.5, %v2965_v52  ;;  %v1199_v55 = vand.u32 2147483647, %v2965_v52 }
 0x17f   :  { %v278_v47 = vadd.f32 %v277_v37, %v2547_v60  ;;  %v391_v25 = vadd.f32 %v390_v10, %v2549_v61  ;;  %v552_v41 = vpop.f32.mrf.mxu2  ;;  %v665_v1 = vpop.f32.mrf.mxu3  ;;  %v732_v61 = vand.u32 2147483647, %v3012_v16  ;;  %v1183_v13 = vsel %vm3038_vm8, %v1180_v29, %v1177_v19 }
 0x180   :  { %v553_v2 = vadd.f32 %v2667_v59, %v552_v41  ;;  %v3054_v60 = vpop.eup %2134  ;;  %v3065_v46 = vadd.f32 %v1174_v50, %v4200_v54  ;;  %v1188_v41 = vadd.f32 1.0, %v1187_v18  ;;  %v3074_v19 = vsel %vm1463_vm9, 1.0, %v4195_v33 }
 0x181   :  { %v455_v37 = vmax.f32 %v278_v47, 0.0  ;;  %v456_v10 = vmax.f32 %v391_v25, 0.0  ;;  %v2137_v6 = vpop.eup %2136  ;;  %v3069_v47 = vmul.f32 %v3048_v57, %v2747_v0  ;;  %4202 = vst [vmem:[#allocation22_spill] sm:$0xff] %v3074_v19  ;;  %v4203_v50 = vmax.f32 %v2779_v39, 0.0 }
 0x182   :  { %v3059_v32 = vadd.f32 %v665_v1, %v553_v2  ;;  %4201 = vst [vmem:[#allocation21_spill] sm:$0xff] %v3065_v46  ;;  %v2139_v28 = vpop.eup %2138  ;;  %v3082_v18 = vmin.f32 %v1016_v11, 1.0  ;;  %v859_v1 = vadd.f32 1.0, %v3054_v60  ;;  %v3087_v29 = vmul.f32 %v2875_v22, %v2705_v8 }
 0x183   :  { %602 = vmatmul.f32.gmra.mxu2 %v455_v37  ;;  %715 = vmatmul.f32.gmra.mxu3 %v456_v10  ;;  %v3080_v25 = vadd.f32 %v1183_v13, %v4203_v50  ;;  %v764_v2 = vsub.f32 0.0, %v732_v61  ;;  %v1432_v37 = vld [vmem:[%s4111_s1 + $0x48] sm:$0xff]  ;;  %v954_v11 = vmul.f32 %v2137_v6, %v3000_v58  ;;  %v3100_v13 = vmul.f32 %v3074_v19, %v2779_v39 }
 0x184   :  { %4205 = vst [vmem:[#allocation24_spill] sm:$0xff] %v3082_v18  ;;  %v1186_v8 = vmul.f32 0.6931472, %v2139_v28  ;;  %v1189_v22 = vmul.f32 %v2905_v12, %v1188_v41  ;;  %v985_v50 = vsel %vm921_vm10, %v2133_v38, %v953_v14  ;;  %vm1464_vm13 = vcmp.lt.f32.partialorder %v1432_v37, %v3082_v18 }
 0x185   :  { %4204 = vst [vmem:[#allocation23_spill] sm:$0xff] %v3080_v25  ;;  %2142 = vrcp.f32 %v859_v1  ;;  %v809_v12 = vmul.f32 1.442695, %v764_v2  ;;  %v986_v41 = vsel %vm922_vm12, %v2137_v6, %v954_v11  ;;  %v733_v38 = vand.u32 2147483647, %v3059_v32  ;;  %v2141_v6 = vpop.eup %2140 }
 0x186   :  { %4206 = vst [vmem:[#allocation25_spill] sm:$0xff] %v3087_v29  ;;  %v510_v10 = vpop.f32.mrf.mxu0  ;;  %v623_v39 = vpop.f32.mrf.mxu1  ;;  %2144 = vlog2.f32 %v3010_v20  ;;  %v1018_v24 = vmax.f32 %v986_v41, 0.0  ;;  %v1205_v11 = vmul.f32 -0.5, %v3000_v58  ;;  %vm3142_vm14 = vcmp.lt.f32.partialorder %v1199_v55, 0.0004427343 }
 0x187   :  { %v511_v15 = vadd.f32 %v2667_v59, %v510_v10  ;;  %v555_v61 = vpop.f32.mrf.mxu2  ;;  %v668_v54 = vpop.f32.mrf.mxu3  ;;  %v1192_v10 = vsel %vm3089_vm11, %v1189_v22, %v1186_v8  ;;  %2146 = vpow2.f32 %v809_v12  ;;  %v4210_v22 = vmax.f32 %v2823_v23, 0.0 }
 0x188   :  { %v556_v57 = vadd.f32 %v2667_v59, %v555_v61  ;;  %v1017_v61 = vmax.f32 %v985_v50, 0.0  ;;  %v1197_v50 = vadd.f32 1.0, %v1196_v9  ;;  %v765_v2 = vsub.f32 0.0, %v733_v38  ;;  %v1433_v9 = vld [vmem:[%s4111_s1 + $0x50] sm:$0xff] }
 0x189   :  { %v3113_v31 = vadd.f32 %v623_v39, %v511_v15  ;;  %2148 = vlog2.f32 %v859_v1  ;;  %v1195_v12 = vmul.f32 0.6931472, %v2141_v6  ;;  %v3155_v38 = vmin.f32 %v1018_v24, 1.0  ;;  %v1434_v6 = vld [vmem:[%s4111_s1 + $0x58] sm:$0xff] }
 0x18a   :  { %v3119_v14 = vadd.f32 %v668_v54, %v556_v57  ;;  %v3133_v57 = vsel %vm1464_vm13, 1.0, %v4195_v33  ;;  %v3138_v54 = vadd.f32 %v1192_v10, %v4210_v22  ;;  %v3140_v15 = vmin.f32 %v1017_v61, 1.0 }
 0x18b   :  { %v719_v19 = vand.u32 2147483647, %v3113_v31  ;;  %4209 = vst [vmem:[#allocation26_spill] sm:$0xff] %v3133_v57  ;;  %v2143_v28 = vpop.eup %2142  ;;  %v1206_v1 = vadd.f32 1.0, %v1205_v11  ;;  %v1208_v10 = vand.u32 2147483647, %v3000_v58  ;;  %v1198_v61 = vmul.f32 %v2965_v52, %v1197_v50 }
 0x18c   :  { %4211 = vst [vmem:[#allocation27_spill] sm:$0xff] %v3138_v54  ;;  %v2145_v37 = vpop.eup %2144  ;;  %v1214_v22 = vmul.f32 -0.5, %v3054_v60  ;;  %vm1465_vm0 = vcmp.lt.f32.partialorder %v1433_v9, %v3140_v15  ;;  %v1083_v11 = vmax.f32 %v2959_v36, 0.0  ;;  %v3176_v50 = vmul.f32 %v2961_v4, %v2723_v34 }
 0x18d   :  { %v751_v8 = vsub.f32 0.0, %v719_v19  ;;  %4212 = vst [vmem:[#allocation28_spill] sm:$0xff] %v3140_v15  ;;  %v3148_v19 = vmul.f32 %v3133_v57, %v2823_v23  ;;  %v811_v23 = vmul.f32 1.442695, %v765_v2  ;;  %v1201_v52 = vsel %vm3142_vm14, %v1198_v61, %v1195_v12 }
 0x18e   :  { %4216 = vst [vmem:[#allocation30_spill] sm:$0xff] %v3155_v38  ;;  %vm3180_vm1 = vcmp.lt.f32.partialorder %v1208_v10, 0.0004427343  ;;  %vm1466_vm2 = vcmp.lt.f32.partialorder %v1434_v6, %v3155_v38  ;;  %v3186_v20 = vsel %vm1465_vm0, 1.0, %v4195_v33  ;;  %v1215_v9 = vadd.f32 1.0, %v1214_v22 }
 0x18f   :  { %v783_v41 = vmul.f32 1.442695, %v751_v8  ;;  %v558_v39 = vpop.f32.mrf.mxu2  ;;  %v671_v18 = vpop.f32.mrf.mxu3  ;;  %4215 = vst [vmem:[#allocation29_spill] sm:$0xff] %v3148_v19  ;;  %v955_v8 = vmul.f32 %v2143_v28, %v3054_v60  ;;  %v1217_v34 = vand.u32 2147483647, %v3054_v60  ;;  %v3198_v24 = vsel %vm1466_vm2, 1.0, %v4195_v33 }
 0x190   :  { %v559_v55 = vadd.f32 %v2667_v59, %v558_v39  ;;  %v1204_v59 = vmul.f32 0.6931472, %v2145_v37  ;;  %v3167_v39 = vpop.eup %2146  ;;  %4218 = vst [vmem:[#allocation32_spill] sm:$0xff] %v3176_v50  ;;  %v734_v10 = vand.u32 2147483647, %v3119_v14  ;;  %v4223_v37 = vmax.f32 %v2868_v45, 0.0 }
 0x191   :  { %2150 = vpow2.f32 %v783_v41  ;;  %4217 = vst [vmem:[#allocation31_spill] sm:$0xff] %v3167_v39  ;;  %v2149_v2 = vpop.eup %2148  ;;  %v1207_v41 = vmul.f32 %v3000_v58, %v1206_v1  ;;  %v987_v12 = vsel %vm923_vm15, %v2143_v28, %v955_v8  ;;  %v3205_v22 = vld [vmem:[%s4115_s5] ss:$0 sm:$0xff]  ;;  %v860_v8 = vadd.f32 1.0, %v3167_v39 }
 0x192   :  { %v3164_v29 = vadd.f32 %v671_v18, %v559_v55  ;;  %4221 = vst [vmem:[#allocation33_spill] sm:$0xff] %v3186_v20  ;;  %2152 = vpow2.f32 %v811_v23  ;;  %v1223_v55 = vmul.f32 -0.5, %v3167_v39  ;;  %v1213_v28 = vmul.f32 0.6931472, %v2149_v2 }
 0x193   :  { %v1210_v58 = vsel %vm3180_vm1, %v1207_v41, %v1204_v59  ;;  %4222 = vst [vmem:[#allocation34_spill] sm:$0xff] %v3198_v24  ;;  %v1019_v41 = vmax.f32 %v987_v12, 0.0  ;;  %v3211_v38 = vadd.f32 %v1201_v52, %v4223_v37  ;;  %v3215_v2 = vmul.f32 %v3186_v20, %v2868_v45 }
 0x194   :  { %v735_v18 = vand.u32 2147483647, %v3164_v29  ;;  %vm3225_vm3 = vcmp.lt.f32.partialorder %v1217_v34, 0.0004427343  ;;  %v766_v52 = vsub.f32 0.0, %v734_v10  ;;  %v4229_v37 = vmax.f32 %v2907_v43, 0.0 }
 0x195   :  { %4224 = vst [vmem:[#allocation35_spill] sm:$0xff] %v3211_v38  ;;  %v1224_v34 = vadd.f32 1.0, %v1223_v55  ;;  %vm911_vm4 = vcmp.ge.f32.partialorder %v3113_v31, 0.0  ;;  %vm927_vm7 = vcmp.ge.f32.partialorder %v3164_v29, 0.0  ;;  %vm924_vm10 = vcmp.ge.f32.partialorder %v3012_v16, 0.0 }
 0x196   :  { %v767_v4 = vsub.f32 0.0, %v735_v18  ;;  %4225 = vst [vmem:[#allocation36_spill] sm:$0xff] %v3215_v2  ;;  %v3231_v45 = vadd.f32 %v1210_v58, %v4229_v37  ;;  %v1435_v58 = vld [vmem:[%s4111_s1 + $0x60] sm:$0xff] }
 0x197   :  { %v3194_v1 = vpop.eup %2150  ;;  %v561_v61 = vpop.f32.mrf.mxu2 }
 0x198   :  { %v674_v6 = vpop.f32.mrf.mxu3  ;;  %v815_v23 = vmul.f32 1.442695, %v767_v4  ;;  %v562_v59 = vadd.f32 %v3205_v22, %v561_v61  ;;  %v847_v18 = vadd.f32 1.0, %v3194_v1  ;;  %v1216_v4 = vmul.f32 %v3054_v60, %v1215_v9  ;;  %4230 = vst [vmem:[#allocation38_spill] sm:$0xff] %v3231_v45  ;;  %v3235_v9 = vpop.eup %2152 }
 0x199   :  { %v3223_v61 = vmul.f32 %v3198_v24, %v2907_v43  ;;  %v3278_v45 = vmul.f32 %v2997_v63, %v2747_v0  ;;  %v1423_v0 = vld [vmem:[%s4111_s1] sm:$0xff] }
 0x19a   :  { %2154 = vpow2.f32 %v815_v23  ;;  %v3219_v15 = vadd.f32 %v674_v6, %v562_v59  ;;  %v1219_v60 = vsel %vm3225_vm3, %v1216_v4, %v1213_v28  ;;  %v3238_v23 = vmin.f32 %v1019_v41, 1.0 }
 0x19b   :  { %4226 = vst [vmem:[#allocation37_spill] sm:$0xff] %v3223_v61  ;;  %2156 = vrcp.f32 %v847_v18  ;;  %v813_v41 = vmul.f32 1.442695, %v766_v52  ;;  %v3251_v43 = vadd.f32 %v1219_v60, %v1083_v11  ;;  %v3259_v28 = vmul.f32 %v3167_v39, %v1224_v34 }
 0x19c   :  { %v736_v6 = vand.u32 2147483647, %v3219_v15  ;;  %2158 = vlog2.f32 %v847_v18  ;;  %4231 = vst [vmem:[#allocation39_spill] sm:$0xff] %v3238_v23  ;;  %v1106_v18 = vmul.f32 -0.5, %v3194_v1  ;;  %vm1467_vm5 = vcmp.lt.f32.partialorder %v1435_v58, %v3238_v23 }
 0x19d   :  { %2160 = vrcp.f32 %v860_v8  ;;  %4232 = vst [vmem:[#allocation40_spill] sm:$0xff] %v3251_v43  ;;  %v3264_v11 = vadd.f32 1.0, %v3235_v9  ;;  %v1109_v34 = vand.u32 2147483647, %v3194_v1  ;;  %v3274_v23 = vsel %vm1467_vm5, 1.0, %v4195_v33 }
 0x19e   :  { %v768_v59 = vsub.f32 0.0, %v736_v6  ;;  %2162 = vlog2.f32 %v860_v8  ;;  %4233 = vst [vmem:[#allocation41_spill] sm:$0xff] %v3259_v28  ;;  %v1232_v8 = vmul.f32 -0.5, %v3235_v9  ;;  %v1107_v58 = vadd.f32 1.0, %v1106_v18 }
 0x19f   :  { %v564_v12 = vpop.f32.mrf.mxu2  ;;  %4234 = vst [vmem:[#allocation42_spill] sm:$0xff] %v3274_v23  ;;  %v3290_v63 = vmul.f32 %v3274_v23, %v2959_v36  ;;  %vm3296_vm6 = vcmp.lt.f32.partialorder %v1109_v34, 0.0004427343  ;;  %vm928_vm11 = vcmp.ge.f32.partialorder %v3219_v15, 0.0 }
 0x1a0   :  { %v677_v37 = vpop.f32.mrf.mxu3  ;;  %v3254_v50 = vpop.eup %2154  ;;  %v817_v24 = vmul.f32 1.442695, %v768_v59  ;;  %v565_v6 = vadd.f32 %v3205_v22, %v564_v12  ;;  %4235 = vst [vmem:[#allocation43_spill] sm:$0xff] %v3278_v45  ;;  %v1108_v2 = vmul.f32 %v3194_v1, %v1107_v58 }
 0x1a1   :  { %v2157_v4 = vpop.eup %2156  ;;  %v863_v52 = vadd.f32 1.0, %v3254_v50  ;;  %v1250_v55 = vmul.f32 -0.5, %v3254_v50  ;;  %v1253_v20 = vand.u32 2147483647, %v3254_v50 }
 0x1a2   :  { %v2159_v60 = vpop.eup %2158  ;;  %2164 = vpow2.f32 %v817_v24  ;;  %v3267_v59 = vadd.f32 %v677_v37, %v565_v6  ;;  %v943_v12 = vmul.f32 %v2157_v4, %v3194_v1 }
 0x1a3   :  { %v3270_v10 = vpop.eup %2160  ;;  %2166 = vrcp.f32 %v863_v52  ;;  %v1105_v37 = vmul.f32 0.6931472, %v2159_v60  ;;  %v1251_v28 = vadd.f32 1.0, %v1250_v55  ;;  %vm3330_vm9 = vcmp.lt.f32.partialorder %v1253_v20, 0.0004427343 }
 0x1a4   :  { %v737_v61 = vand.u32 2147483647, %v3267_v59  ;;  %v975_v24 = vsel %vm911_vm4, %v2157_v4, %v943_v12  ;;  %2168 = vlog2.f32 %v863_v52  ;;  %v2163_v18 = vpop.eup %2162  ;;  %v3294_v4 = vmul.f32 %v3270_v10, %v3167_v39 }
 0x1a5   :  { %2170 = vpow2.f32 %v813_v41  ;;  %v1007_v6 = vmax.f32 %v975_v24, 0.0  ;;  %v1111_v58 = vsel %vm3296_vm6, %v1108_v2, %v1105_v37  ;;  %v1252_v34 = vmul.f32 %v3254_v50, %v1251_v28 }
 0x1a6   :  { %v769_v38 = vsub.f32 0.0, %v737_v61  ;;  %2172 = vrcp.f32 %v3264_v11  ;;  %v4238_v37 = vmax.f32 %v3113_v31, 0.0  ;;  %vm929_vm14 = vcmp.ge.f32.partialorder %v3267_v59, 0.0 }
 0x1a7   :  { %v567_v41 = vpop.f32.mrf.mxu2  ;;  %v1039_v55 = vmin.f32 %v1007_v6, 1.0 }
 0x1a8   :  { %v680_v52 = vpop.f32.mrf.mxu3  ;;  %v3302_v1 = vpop.eup %2164  ;;  %v819_v61 = vmul.f32 1.442695, %v769_v38  ;;  %v568_v12 = vadd.f32 %v3205_v22, %v567_v41  ;;  %v3320_v60 = vadd.f32 %v1111_v58, %v4238_v37 }
 0x1a9   :  { %v2167_v6 = vpop.eup %2166  ;;  %vm1455_vm8 = vcmp.lt.f32.partialorder %v1423_v0, %v1039_v55  ;;  %v864_v36 = vadd.f32 1.0, %v3302_v1 }
 0x1aa   :  { %v2169_v23 = vpop.eup %2168  ;;  %2174 = vpow2.f32 %v819_v61  ;;  %v3312_v39 = vadd.f32 %v680_v52, %v568_v12  ;;  %v1965_v38 = vsel %vm1455_vm8, 1.0, %v4195_v33  ;;  %v959_v41 = vmul.f32 %v2167_v6, %v3254_v50 }
 0x1ab   :  { %v3316_v2 = vpop.eup %2170  ;;  %v1551_v28 = vmul.f32 %v1965_v38, %v3113_v31  ;;  %v1249_v0 = vmul.f32 0.6931472, %v2169_v23  ;;  %2176 = vrcp.f32 %v864_v36  ;;  %v1259_v61 = vmul.f32 -0.5, %v3302_v1 }
 0x1ac   :  { %v738_v24 = vand.u32 2147483647, %v3312_v39  ;;  %v991_v52 = vsel %vm927_vm7, %v2167_v6, %v959_v41  ;;  %2178 = vlog2.f32 %v864_v36  ;;  %v3327_v12 = vpop.eup %2172  ;;  %v3335_v23 = vadd.f32 1.0, %v1232_v8  ;;  %v1439_v36 = vld [vmem:[%s4111_s1 + $0x80] sm:$0xff] }
 0x1ad   :  { %v1583_v50 = vsub.f32 %v1551_v28, %v3320_v60  ;;  %v1023_v45 = vmax.f32 %v991_v52, 0.0  ;;  %v1087_v6 = vmax.f32 %v3164_v29, 0.0  ;;  %v1255_v41 = vsel %vm3330_vm9, %v1252_v34, %v1249_v0 }
 0x1ae   :  { %v770_v37 = vsub.f32 0.0, %v738_v24  ;;  %v3343_v28 = vmul.f32 0.6931472, %v2163_v18  ;;  %v1262_v8 = vand.u32 2147483647, %v3302_v1  ;;  %v1260_v58 = vadd.f32 1.0, %v1259_v61 }
 0x1af   :  { %v570_v20 = vpop.f32.mrf.mxu2  ;;  %1743 = vxpose.xlu1.b32.start [1/16] (narrow) %v1583_v50, 16  ;;  %v1055_v57 = vmin.f32 %v1023_v45, 1.0  ;;  %v3353_v18 = vmul.f32 %v1039_v55, %v3113_v31  ;;  %v3355_v0 = vadd.f32 %v1255_v41, %v1087_v6  ;;  %vm930_vm1 = vcmp.ge.f32.partialorder %v3312_v39, 0.0 }
 0x1b0   :  { %4241 = vst [vmem:[#allocation44_spill] sm:$0xff] %v3343_v28  ;;  %v683_v52 = vpop.f32.mrf.mxu3  ;;  %v3349_v54 = vpop.eup %2174  ;;  %v821_v19 = vmul.f32 1.442695, %v770_v37  ;;  %v571_v25 = vadd.f32 %v3205_v22, %v570_v20  ;;  %v1261_v41 = vmul.f32 %v3302_v1, %v1260_v58  ;;  %vm3369_vm13 = vcmp.lt.f32.partialorder %v1262_v8, 0.0004427343 }
 0x1b1   :  { %v2177_v34 = vpop.eup %2176  ;;  %vm1471_vm12 = vcmp.lt.f32.partialorder %v1439_v36, %v1055_v57  ;;  %v865_v45 = vadd.f32 1.0, %v3349_v54  ;;  %v1268_v50 = vmul.f32 -0.5, %v3349_v54  ;;  %v4244_v58 = vsub.f32 %v2789_v49, %v2730_v42 }
 0x1b2   :  { %v2179_v28 = vpop.eup %2178  ;;  %2180 = vpow2.f32 %v821_v19  ;;  %v3359_v24 = vadd.f32 %v683_v52, %v571_v25  ;;  %v1981_v37 = vsel %vm1471_vm12, 1.0, %v4195_v33  ;;  %v960_v20 = vmul.f32 %v2177_v34, %v3302_v1 }
 0x1b3   :  { %v2033_v61 = vpack.i.bf16 %v1981_v37, %v1965_v38  ;;  %v1567_v31 = vmul.f32 %v1981_v37, %v3164_v29  ;;  %v1258_v55 = vmul.f32 0.6931472, %v2179_v28  ;;  %2182 = vrcp.f32 %v865_v45  ;;  %v1440_v28 = vld [vmem:[%s4111_s1 + $0x88] sm:$0xff] }
 0x1b4   :  { %v739_v36 = vand.u32 2147483647, %v3359_v24  ;;  %v992_v6 = vsel %vm928_vm11, %v2177_v34, %v960_v20  ;;  %2184 = vlog2.f32 %v865_v45  ;;  %v1269_v38 = vadd.f32 1.0, %v1268_v50 }
 0x1b5   :  { %2034 = vxpose.xlu0.b32.start [1/16] (narrow) %v2033_v61, 16  ;;  %v1599_v25 = vsub.f32 %v1567_v31, %v3355_v0  ;;  %v1024_v19 = vmax.f32 %v992_v6, 0.0  ;;  %v1264_v34 = vsel %vm3369_vm13, %v1261_v41, %v1258_v55  ;;  %v3382_v1 = vsel %vm924_vm10, %v3270_v10, %v3294_v4 }
 0x1b6   :  { %v771_v37 = vsub.f32 0.0, %v739_v36  ;;  %2186 = vlog2.f32 %v3264_v11  ;;  %v1088_v20 = vmax.f32 %v3219_v15, 0.0  ;;  %v3391_v61 = vmul.f32 %v1055_v57, %v3164_v29 }
 0x1b7   :  { %v573_v8 = vpop.f32.mrf.mxu2  ;;  %1775 = vxpose.xlu2.b32.start [1/16] (narrow) %v1599_v25, 16  ;;  %1744 = vxpose.xlu1.b32.cont [2/16] (narrow) %v4244_v58, 16  ;;  %v1056_v50 = vmin.f32 %v1024_v19, 1.0  ;;  %v1271_v4 = vand.u32 2147483647, %v3349_v54  ;;  %v1270_v6 = vmul.f32 %v3349_v54, %v1269_v38  ;;  %vm931_vm4 = vcmp.ge.f32.partialorder %v3359_v24, 0.0 }
 0x1b8   :  { %v686_v45 = vpop.f32.mrf.mxu3  ;;  %v3393_v31 = vpop.eup %2180  ;;  %v823_v10 = vmul.f32 1.442695, %v771_v37  ;;  %v574_v11 = vadd.f32 %v3205_v22, %v573_v8  ;;  %v3399_v36 = vadd.f32 %v1264_v34, %v1088_v20  ;;  %v3422_v20 = vmul.f32 %v3235_v9, %v3335_v23 }
 0x1b9   :  { %v2183_v55 = vpop.eup %2182  ;;  %vm1472_vm15 = vcmp.lt.f32.partialorder %v1440_v28, %v1056_v50  ;;  %v866_v41 = vadd.f32 1.0, %v3393_v31  ;;  %v1277_v58 = vmul.f32 -0.5, %v3393_v31  ;;  %vm3416_vm0 = vcmp.lt.f32.partialorder %v1271_v4, 0.0004427343 }
 0x1ba   :  { %v2185_v29 = vpop.eup %2184  ;;  %2188 = vpow2.f32 %v823_v10  ;;  %v3403_v57 = vadd.f32 %v686_v45, %v574_v11  ;;  %v1982_v25 = vsel %vm1472_vm15, 1.0, %v4195_v33  ;;  %v961_v19 = vmul.f32 %v2183_v55, %v3349_v54  ;;  %v1441_v11 = vld [vmem:[%s4111_s1 + $0x90] sm:$0xff] }
 0x1bb   :  { %v2035_v52 = vpack.i.bf16 %v1982_v25, %v2763_v17  ;;  %v1568_v37 = vmul.f32 %v1982_v25, %v3219_v15  ;;  %v1267_v8 = vmul.f32 0.6931472, %v2185_v29  ;;  %2190 = vrcp.f32 %v866_v41 }
 0x1bc   :  { %v3409_v28 = vpop.eup %2186  ;;  %v740_v38 = vand.u32 2147483647, %v3403_v57  ;;  %v993_v34 = vsel %vm929_vm14, %v2183_v55, %v961_v19  ;;  %2192 = vlog2.f32 %v866_v41  ;;  %v1089_v55 = vmax.f32 %v3267_v59, 0.0 }
 0x1bd   :  { %2036 = vxpose.xlu0.b32.cont [2/16] (narrow) %v2035_v52, 16  ;;  %v1600_v45 = vsub.f32 %v1568_v37, %v3399_v36  ;;  %v1025_v54 = vmax.f32 %v993_v34, 0.0  ;;  %v1273_v41 = vsel %vm3416_vm0, %v1270_v6, %v1267_v8  ;;  %v4247_v25 = vsub.f32 %v2820_v21, %v2793_v53 }
 0x1be   :  { %v772_v10 = vsub.f32 0.0, %v740_v38  ;;  %v1280_v52 = vand.u32 2147483647, %v3393_v31  ;;  %v1278_v34 = vadd.f32 1.0, %v1277_v58  ;;  %v3444_v17 = vadd.f32 %v1273_v41, %v1089_v55 }
 0x1bf   :  { %v576_v4 = vpop.f32.mrf.mxu2  ;;  %1776 = vxpose.xlu2.b32.cont [2/16] (narrow) %v1600_v45, 16  ;;  %1745 = vxpose.xlu1.b32.cont [3/16] (narrow) %v4247_v25, 16  ;;  %v1057_v19 = vmin.f32 %v1025_v54, 1.0  ;;  %v3442_v45 = vmul.f32 %v1056_v50, %v3219_v15  ;;  %vm932_vm7 = vcmp.ge.f32.partialorder %v3403_v57, 0.0  ;;  %vm926_vm13 = vcmp.ge.f32.partialorder %v3119_v14, 0.0 }
 0x1c0   :  { %v689_v23 = vpop.f32.mrf.mxu3  ;;  %v3438_v38 = vpop.eup %2188  ;;  %v825_v6 = vmul.f32 1.442695, %v772_v10  ;;  %v577_v8 = vadd.f32 %v3205_v22, %v576_v4  ;;  %v1279_v41 = vmul.f32 %v3393_v31, %v1278_v34  ;;  %vm3459_vm3 = vcmp.lt.f32.partialorder %v1280_v52, 0.0004427343 }
 0x1c1   :  { %v2191_v21 = vpop.eup %2190  ;;  %vm1473_vm2 = vcmp.lt.f32.partialorder %v1441_v11, %v1057_v19  ;;  %v867_v54 = vadd.f32 1.0, %v3438_v38  ;;  %v1286_v25 = vmul.f32 -0.5, %v3438_v38  ;;  %v4250_v52 = vsub.f32 %v2866_v5, %v2838_v40 }
 0x1c2   :  { %v2193_v49 = vpop.eup %2192  ;;  %2194 = vpow2.f32 %v825_v6  ;;  %v3448_v37 = vadd.f32 %v689_v23, %v577_v8  ;;  %v1983_v10 = vsel %vm1473_vm2, 1.0, %v4195_v33  ;;  %v962_v4 = vmul.f32 %v2191_v21, %v3393_v31 }
 0x1c3   :  { %v2037_v58 = vpack.i.bf16 %v1983_v10, %v2802_v7  ;;  %v1569_v15 = vmul.f32 %v1983_v10, %v3267_v59  ;;  %v1276_v50 = vmul.f32 0.6931472, %v2193_v49  ;;  %2196 = vrcp.f32 %v867_v54  ;;  %v1442_v49 = vld [vmem:[%s4111_s1 + $0x98] sm:$0xff] }
 0x1c4   :  { %v741_v11 = vand.u32 2147483647, %v3448_v37  ;;  %v994_v55 = vsel %vm930_vm1, %v2191_v21, %v962_v4  ;;  %2198 = vlog2.f32 %v867_v54  ;;  %v1287_v7 = vadd.f32 1.0, %v1286_v25 }
 0x1c5   :  { %2038 = vxpose.xlu0.b32.cont [3/16] (narrow) %v2037_v58, 16  ;;  %v1601_v23 = vsub.f32 %v1569_v15, %v3444_v17  ;;  %v1026_v6 = vmax.f32 %v994_v55, 0.0  ;;  %v1282_v21 = vsel %vm3459_vm3, %v1279_v41, %v1276_v50  ;;  %v3469_v31 = vadd.f32 1.0, %v3316_v2 }
 0x1c6   :  { %v773_v10 = vsub.f32 0.0, %v741_v11  ;;  %v1090_v58 = vmax.f32 %v3312_v39, 0.0  ;;  %v1289_v41 = vand.u32 2147483647, %v3438_v38  ;;  %v1288_v8 = vmul.f32 %v3438_v38, %v1287_v7 }
 0x1c7   :  { %v579_v54 = vpop.f32.mrf.mxu2  ;;  %1777 = vxpose.xlu2.b32.cont [3/16] (narrow) %v1601_v23, 16  ;;  %1746 = vxpose.xlu1.b32.cont [4/16] (narrow) %v4250_v52, 16  ;;  %v1058_v4 = vmin.f32 %v1026_v6, 1.0  ;;  %v3484_v23 = vmul.f32 %v1057_v19, %v3267_v59  ;;  %vm933_vm10 = vcmp.ge.f32.partialorder %v3448_v37, 0.0 }
 0x1c8   :  { %v692_v25 = vpop.f32.mrf.mxu3  ;;  %v3479_v50 = vpop.eup %2194  ;;  %v827_v11 = vmul.f32 1.442695, %v773_v10  ;;  %v580_v55 = vadd.f32 %v3205_v22, %v579_v54  ;;  %v3486_v6 = vadd.f32 %v1282_v21, %v1090_v58  ;;  %vm3501_vm6 = vcmp.lt.f32.partialorder %v1289_v41, 0.0004427343 }
 0x1c9   :  { %v2197_v5 = vpop.eup %2196  ;;  %vm1474_vm5 = vcmp.lt.f32.partialorder %v1442_v49, %v1058_v4  ;;  %v868_v52 = vadd.f32 1.0, %v3479_v50  ;;  %v1295_v21 = vmul.f32 -0.5, %v3479_v50 }
 0x1ca   :  { %v2199_v34 = vpop.eup %2198  ;;  %2200 = vpow2.f32 %v827_v11  ;;  %v3490_v15 = vadd.f32 %v692_v25, %v580_v55  ;;  %v1984_v10 = vsel %vm1474_vm5, 1.0, %v4195_v33  ;;  %v963_v54 = vmul.f32 %v2197_v5, %v3438_v38  ;;  %v1443_v55 = vld [vmem:[%s4111_s1 + $0xa0] sm:$0xff] }
 0x1cb   :  { %v2039_v29 = vpack.i.bf16 %v1984_v10, %v2842_v48  ;;  %v1570_v59 = vmul.f32 %v1984_v10, %v3312_v39  ;;  %v1285_v19 = vmul.f32 0.6931472, %v2199_v34  ;;  %2202 = vrcp.f32 %v868_v52 }
 0x1cc   :  { %v742_v49 = vand.u32 2147483647, %v3490_v15  ;;  %v995_v7 = vsel %vm931_vm4, %v2197_v5, %v963_v54  ;;  %2204 = vlog2.f32 %v868_v52  ;;  %v4253_v48 = vmax.f32 %v3382_v1, 0.0 }
 0x1cd   :  { %2040 = vxpose.xlu0.b32.cont [4/16] (narrow) %v2039_v29, 16  ;;  %v1602_v25 = vsub.f32 %v1570_v59, %v3486_v6  ;;  %v1027_v58 = vmax.f32 %v995_v7, 0.0  ;;  %v1091_v5 = vmax.f32 %v3359_v24, 0.0  ;;  %v1291_v29 = vsel %vm3501_vm6, %v1288_v8, %v1285_v19 }
 0x1ce   :  { %v3507_v34 = vmin.f32 %v4253_v48, 1.0  ;;  %v774_v11 = vsub.f32 0.0, %v742_v49  ;;  %2206 = vrcp.f32 %v3469_v31  ;;  %v4255_v52 = vsub.f32 %v2928_v51, %v2911_v35  ;;  %v1444_v35 = vld [vmem:[%s4111_s1 + $0xa8] sm:$0xff] }
 0x1cf   :  { %v582_v41 = vpop.f32.mrf.mxu2  ;;  %1778 = vxpose.xlu2.b32.cont [4/16] (narrow) %v1602_v25, 16  ;;  %v1059_v10 = vmin.f32 %v1027_v58, 1.0  ;;  %v1298_v54 = vand.u32 2147483647, %v3479_v50  ;;  %v1296_v7 = vadd.f32 1.0, %v1295_v21  ;;  %v3527_v25 = vmul.f32 %v1058_v4, %v3312_v39 }
 0x1d0   :  { %4254 = vst [vmem:[#allocation45_spill] sm:$0xff] %v3507_v34  ;;  %1747 = vxpose.xlu1.b32.cont [5/16] (narrow) %v4255_v52, 16  ;;  %v695_v1 = vpop.f32.mrf.mxu3  ;;  %v3523_v49 = vpop.eup %2200  ;;  %v829_v8 = vmul.f32 1.442695, %v774_v11  ;;  %v583_v19 = vadd.f32 %v3205_v22, %v582_v41  ;;  %v3529_v38 = vadd.f32 %v1291_v29, %v1091_v5  ;;  %vm934_vm14 = vcmp.ge.f32.partialorder %v3490_v15, 0.0 }
 0x1d1   :  { %v2203_v51 = vpop.eup %2202  ;;  %vm1475_vm8 = vcmp.lt.f32.partialorder %v1443_v55, %v1059_v10  ;;  %v869_v58 = vadd.f32 1.0, %v3523_v49  ;;  %v1304_v48 = vmul.f32 -0.5, %v3523_v49  ;;  %vm3546_vm9 = vcmp.lt.f32.partialorder %v1298_v54, 0.0004427343 }
 0x1d2   :  { %4256 = vst [vmem:[#allocation46_spill] sm:$0xff] %v3529_v38  ;;  %v2205_v52 = vpop.eup %2204  ;;  %2208 = vpow2.f32 %v829_v8  ;;  %v3533_v59 = vadd.f32 %v695_v1, %v583_v19  ;;  %v1985_v11 = vsel %vm1475_vm8, 1.0, %v4195_v33  ;;  %v964_v41 = vmul.f32 %v2203_v51, %v3479_v50 }
 0x1d3   :  { %v2041_v21 = vpack.i.bf16 %v1985_v11, %v2892_v56  ;;  %v1571_v39 = vmul.f32 %v1985_v11, %v3359_v24  ;;  %v1294_v4 = vmul.f32 0.6931472, %v2205_v52  ;;  %2210 = vrcp.f32 %v869_v58 }
 0x1d4   :  { %v3539_v55 = vpop.eup %2206  ;;  %v743_v5 = vand.u32 2147483647, %v3533_v59  ;;  %v996_v29 = vsel %vm932_vm7, %v2203_v51, %v964_v41  ;;  %v1297_v1 = vmul.f32 %v3479_v50, %v1296_v7  ;;  %2212 = vlog2.f32 %v869_v58 }
 0x1d5   :  { %2042 = vxpose.xlu0.b32.cont [5/16] (narrow) %v2041_v21, 16  ;;  %v1603_v8 = vsub.f32 %v1571_v39, %v3529_v38  ;;  %v1028_v19 = vmax.f32 %v996_v29, 0.0  ;;  %v1305_v52 = vadd.f32 1.0, %v1304_v48  ;;  %v3557_v50 = vmul.f32 %v3327_v12, %v3235_v9  ;;  %v4297_v38 = vld [vmem:[#allocation44_spill] sm:$0xff] }
 0x1d6   :  { %v775_v11 = vsub.f32 0.0, %v743_v5  ;;  %v1300_v51 = vsel %vm3546_vm9, %v1297_v1, %v1294_v4  ;;  %v3560_v7 = vmul.f32 -0.5, %v3316_v2  ;;  %v4259_v58 = vsub.f32 %v2938_v26, %v2971_v62 }
 0x1d7   :  { %v585_v54 = vpop.f32.mrf.mxu2  ;;  %1779 = vxpose.xlu2.b32.cont [5/16] (narrow) %v1603_v8, 16  ;;  %v1060_v41 = vmin.f32 %v1028_v19, 1.0  ;;  %v1092_v21 = vmax.f32 %v3403_v57, 0.0  ;;  %v3569_v4 = vmul.f32 %v1059_v10, %v3359_v24  ;;  %v1307_v26 = vand.u32 2147483647, %v3523_v49 }
 0x1d8   :  { %1748 = vxpose.xlu1.b32.cont [6/16] (narrow) %v4259_v58, 16  ;;  %v698_v48 = vpop.f32.mrf.mxu3  ;;  %v3571_v5 = vpop.eup %2208  ;;  %v831_v29 = vmul.f32 1.442695, %v775_v11  ;;  %v586_v1 = vadd.f32 %v3205_v22, %v585_v54  ;;  %v1306_v56 = vmul.f32 %v3523_v49, %v1305_v52  ;;  %vm935_vm1 = vcmp.ge.f32.partialorder %v3533_v59, 0.0 }
 0x1d9   :  { %4260 = vst [vmem:[#allocation47_spill] sm:$0xff] %v3569_v4  ;;  %v2211_v8 = vpop.eup %2210  ;;  %vm1476_vm11 = vcmp.lt.f32.partialorder %v1444_v35, %v1060_v41  ;;  %v3576_v19 = vadd.f32 %v1300_v51, %v1092_v21  ;;  %v870_v58 = vadd.f32 1.0, %v3571_v5  ;;  %v1313_v51 = vmul.f32 -0.5, %v3571_v5 }
 0x1da   :  { %v2213_v39 = vpop.eup %2212  ;;  %2214 = vpow2.f32 %v831_v29  ;;  %v3580_v24 = vadd.f32 %v698_v48, %v586_v1  ;;  %v1986_v10 = vsel %vm1476_vm11, 1.0, %v4195_v33  ;;  %v965_v11 = vmul.f32 %v2211_v8, %v3523_v49 }
 0x1db   :  { %4261 = vst [vmem:[#allocation48_spill] sm:$0xff] %v3576_v19  ;;  %v2043_v54 = vpack.i.bf16 %v1986_v10, %v2915_v3  ;;  %v1572_v62 = vmul.f32 %v1986_v10, %v3403_v57  ;;  %v1303_v40 = vmul.f32 0.6931472, %v2213_v39  ;;  %2216 = vrcp.f32 %v870_v58  ;;  %v1445_v39 = vld [vmem:[%s4111_s1 + $0xb0] sm:$0xff] }
 0x1dc   :  { %v744_v35 = vand.u32 2147483647, %v3580_v24  ;;  %v997_v52 = vsel %vm933_vm10, %v2211_v8, %v965_v11  ;;  %2218 = vlog2.f32 %v870_v58  ;;  %vm3591_vm12 = vcmp.lt.f32.partialorder %v1307_v26, 0.0004427343 }
 0x1dd   :  { %2044 = vxpose.xlu0.b32.cont [6/16] (narrow) %v2043_v54, 16  ;;  %v1604_v48 = vsub.f32 %v1572_v62, %v3576_v19  ;;  %v1029_v21 = vmax.f32 %v997_v52, 0.0  ;;  %2220 = vlog2.f32 %v3469_v31  ;;  %v1093_v29 = vmax.f32 %v3448_v37, 0.0 }
 0x1de   :  { %v776_v3 = vsub.f32 0.0, %v744_v35  ;;  %v1309_v1 = vsel %vm3591_vm12, %v1306_v56, %v1303_v40  ;;  %v958_v62 = vmul.f32 %v3539_v55, %v3316_v2  ;;  %v4264_v31 = vsub.f32 %v3034_v27, %v2985_v30 }
 0x1df   :  { %v588_v26 = vpop.f32.mrf.mxu2  ;;  %1780 = vxpose.xlu2.b32.cont [6/16] (narrow) %v1604_v48, 16  ;;  %v3608_v58 = vmin.f32 %v1029_v21, 1.0  ;;  %v3614_v40 = vmul.f32 %v1060_v41, %v3403_v57  ;;  %v1314_v35 = vadd.f32 1.0, %v1313_v51  ;;  %v1316_v27 = vand.u32 2147483647, %v3571_v5 }
 0x1e0   :  { %1749 = vxpose.xlu1.b32.cont [7/16] (narrow) %v4264_v31, 16  ;;  %v701_v8 = vpop.f32.mrf.mxu3  ;;  %v3616_v56 = vpop.eup %2214  ;;  %v833_v11 = vmul.f32 1.442695, %v776_v3  ;;  %v589_v54 = vadd.f32 %v3205_v22, %v588_v26  ;;  %v3621_v48 = vadd.f32 %v1309_v1, %v1093_v29  ;;  %v3656_v30 = vsel %vm926_vm13, %v3539_v55, %v958_v62 }
 0x1e1   :  { %4265 = vst [vmem:[#allocation49_spill] sm:$0xff] %v3614_v40  ;;  %v2217_v52 = vpop.eup %2216  ;;  %vm1477_vm15 = vcmp.lt.f32.partialorder %v1445_v39, %v3608_v58  ;;  %v871_v21 = vadd.f32 1.0, %v3616_v56  ;;  %v1322_v49 = vmul.f32 -0.5, %v3616_v56  ;;  %vm3636_vm0 = vcmp.lt.f32.partialorder %v1316_v27, 0.0004427343 }
 0x1e2   :  { %4266 = vst [vmem:[#allocation50_spill] sm:$0xff] %v3621_v48  ;;  %v2219_v31 = vpop.eup %2218  ;;  %2222 = vpow2.f32 %v833_v11  ;;  %v3625_v57 = vadd.f32 %v701_v8, %v589_v54  ;;  %v1987_v41 = vsel %vm1477_vm15, 1.0, %v4195_v33  ;;  %v966_v3 = vmul.f32 %v2217_v52, %v3571_v5 }
 0x1e3   :  { %v2221_v51 = vpop.eup %2220  ;;  %v2045_v26 = vpack.i.bf16 %v1987_v41, %v3019_v44  ;;  %v1573_v10 = vmul.f32 %v1987_v41, %v3448_v37  ;;  %v1312_v39 = vmul.f32 0.6931472, %v2219_v31  ;;  %2224 = vrcp.f32 %v871_v21  ;;  %v1446_v31 = vld [vmem:[%s4111_s1 + $0xb8] sm:$0xff] }
 0x1e4   :  { %v745_v29 = vand.u32 2147483647, %v3625_v57  ;;  %v998_v1 = vsel %vm934_vm14, %v2217_v52, %v966_v3  ;;  %v1315_v11 = vmul.f32 %v3571_v5, %v1314_v35  ;;  %2226 = vlog2.f32 %v871_v21 }
 0x1e5   :  { %2046 = vxpose.xlu0.b32.cont [7/16] (narrow) %v2045_v26, 16  ;;  %v1605_v8 = vsub.f32 %v1573_v10, %v3621_v48  ;;  %v1030_v54 = vmax.f32 %v998_v1, 0.0  ;;  %v1323_v44 = vadd.f32 1.0, %v1322_v49  ;;  %v1242_v5 = vadd.f32 1.0, %v3560_v7 }
 0x1e6   :  { %v777_v41 = vsub.f32 0.0, %v745_v29  ;;  %v1318_v52 = vsel %vm3636_vm0, %v1315_v11, %v1312_v39  ;;  %v1244_v35 = vand.u32 2147483647, %v3316_v2  ;;  %v4269_v10 = vsub.f32 %v3069_v47, %v3065_v46 }
 0x1e7   :  { %v591_v21 = vpop.f32.mrf.mxu2  ;;  %1781 = vxpose.xlu2.b32.cont [7/16] (narrow) %v1605_v8, 16  ;;  %v3650_v49 = vmin.f32 %v1030_v54, 1.0  ;;  %v1094_v3 = vmax.f32 %v3490_v15, 0.0  ;;  %v1325_v47 = vand.u32 2147483647, %v3616_v56  ;;  %v1324_v55 = vmul.f32 %v3616_v56, %v1323_v44 }
 0x1e8   :  { %1750 = vxpose.xlu1.b32.cont [8/16] (narrow) %v4269_v10, 16  ;;  %v704_v27 = vpop.f32.mrf.mxu3  ;;  %v3660_v26 = vpop.eup %2222  ;;  %v835_v39 = vmul.f32 1.442695, %v777_v41  ;;  %v592_v29 = vadd.f32 %v3205_v22, %v591_v21  ;;  %v4270_v10 = vld [vmem:[#allocation20_spill] sm:$0xff]  ;;  %vm925_vm4 = vcmp.ge.f32.partialorder %v3059_v32, 0.0  ;;  %vm936_vm6 = vcmp.ge.f32.partialorder %v3580_v24, 0.0 }
 0x1e9   :  { %v2225_v1 = vpop.eup %2224  ;;  %vm1478_vm2 = vcmp.lt.f32.partialorder %v1446_v31, %v3650_v49  ;;  %v3666_v11 = vadd.f32 %v1318_v52, %v1094_v3  ;;  %v872_v62 = vadd.f32 1.0, %v3660_v26  ;;  %v1331_v52 = vmul.f32 -0.5, %v3660_v26 }
 0x1ea   :  { %v2227_v8 = vpop.eup %2226  ;;  %2228 = vpow2.f32 %v835_v39  ;;  %v3670_v54 = vadd.f32 %v704_v27, %v592_v29  ;;  %v1988_v41 = vsel %vm1478_vm2, 1.0, %v4195_v33  ;;  %v967_v21 = vmul.f32 %v2225_v1, %v3616_v56 }
 0x1eb   :  { %v2047_v7 = vpack.i.bf16 %v1988_v41, %v4270_v10  ;;  %v1574_v46 = vmul.f32 %v1988_v41, %v3490_v15  ;;  %v1321_v40 = vmul.f32 0.6931472, %v2227_v8  ;;  %2230 = vrcp.f32 %v872_v62  ;;  %v4275_v8 = vld [vmem:[#allocation23_spill] sm:$0xff] }
 0x1ec   :  { %v746_v31 = vand.u32 2147483647, %v3670_v54  ;;  %v999_v44 = vsel %vm935_vm1, %v2225_v1, %v967_v21  ;;  %2232 = vlog2.f32 %v872_v62  ;;  %vm3681_vm3 = vcmp.lt.f32.partialorder %v1325_v47, 0.0004427343  ;;  %v1447_v1 = vld [vmem:[%s4111_s1 + $0xc0] sm:$0xff] }
 0x1ed   :  { %2048 = vxpose.xlu0.b32.cont [8/16] (narrow) %v2047_v7, 16  ;;  %v1606_v27 = vsub.f32 %v1574_v46, %v3666_v11  ;;  %v1031_v3 = vmax.f32 %v999_v44, 0.0  ;;  %v3687_v39 = vmul.f32 %v3316_v2, %v1242_v5  ;;  %v1327_v7 = vsel %vm3681_vm3, %v1324_v55, %v1321_v40 }
 0x1ee   :  { %v778_v29 = vsub.f32 0.0, %v746_v31  ;;  %v3694_v62 = vmul.f32 0.6931472, %v2221_v51  ;;  %vm3696_vm5 = vcmp.lt.f32.partialorder %v1244_v35, 0.0004427343  ;;  %v4276_v2 = vsub.f32 %v3100_v13, %v4275_v8 }
 0x1ef   :  { %v594_v47 = vpop.f32.mrf.mxu2  ;;  %1782 = vxpose.xlu2.b32.cont [8/16] (narrow) %v1606_v27, 16  ;;  %v3703_v41 = vmin.f32 %v1031_v3, 1.0  ;;  %v1095_v21 = vmax.f32 %v3533_v59, 0.0  ;;  %v1022_v10 = vmax.f32 %v3656_v30, 0.0  ;;  %v3709_v40 = vmul.f32 %v3608_v58, %v3448_v37 }
 0x1f0   :  { %1751 = vxpose.xlu1.b32.cont [9/16] (narrow) %v4276_v2, 16  ;;  %v707_v5 = vpop.f32.mrf.mxu3  ;;  %v3711_v51 = vpop.eup %2228  ;;  %v837_v35 = vmul.f32 1.442695, %v778_v29  ;;  %v595_v55 = vadd.f32 %v3205_v22, %v594_v47  ;;  %v1332_v13 = vadd.f32 1.0, %v1331_v52  ;;  %v1334_v27 = vand.u32 2147483647, %v3660_v26 }
 0x1f1   :  { %4277 = vst [vmem:[#allocation20_spill] sm:$0xff] %v3709_v40  ;;  %v2231_v31 = vpop.eup %2230  ;;  %vm1479_vm7 = vcmp.lt.f32.partialorder %v1447_v1, %v3703_v41  ;;  %v3716_v44 = vadd.f32 %v1327_v7, %v1095_v21  ;;  %v873_v30 = vadd.f32 1.0, %v3711_v51  ;;  %v4278_v29 = vld [vmem:[#allocation22_spill] sm:$0xff]  ;;  %vm937_vm9 = vcmp.ge.f32.partialorder %v3625_v57, 0.0 }
 0x1f2   :  { %v2233_v3 = vpop.eup %2232  ;;  %2234 = vpow2.f32 %v837_v35  ;;  %v3720_v37 = vadd.f32 %v707_v5, %v595_v55  ;;  %v1989_v58 = vsel %vm1479_vm7, 1.0, %v4195_v33  ;;  %v968_v56 = vmul.f32 %v2231_v31, %v3660_v26 }
 0x1f3   :  { %v2049_v47 = vpack.i.bf16 %v1989_v58, %v4278_v29  ;;  %v1575_v52 = vmul.f32 %v1989_v58, %v3533_v59  ;;  %v1330_v2 = vmul.f32 0.6931472, %v2233_v3  ;;  %2236 = vrcp.f32 %v873_v30  ;;  %v1448_v29 = vld [vmem:[%s4111_s1 + $0xc8] sm:$0xff] }
 0x1f4   :  { %v747_v1 = vand.u32 2147483647, %v3720_v37  ;;  %v1000_v7 = vsel %vm936_vm6, %v2231_v31, %v968_v56  ;;  %v1333_v21 = vmul.f32 %v3660_v26, %v1332_v13  ;;  %2238 = vlog2.f32 %v873_v30  ;;  %v4281_v30 = vld [vmem:[#allocation29_spill] sm:$0xff]  ;;  %v4282_v56 = vld [vmem:[#allocation27_spill] sm:$0xff] }
 0x1f5   :  { %2050 = vxpose.xlu0.b32.cont [9/16] (narrow) %v2049_v47, 16  ;;  %v1607_v5 = vsub.f32 %v1575_v52, %v3716_v44  ;;  %v1032_v35 = vmax.f32 %v1000_v7, 0.0  ;;  %vm3731_vm8 = vcmp.lt.f32.partialorder %v1334_v27, 0.0004427343  ;;  %v1340_v58 = vmul.f32 -0.5, %v3711_v51 }
 0x1f6   :  { %v779_v3 = vsub.f32 0.0, %v747_v1  ;;  %v1336_v31 = vsel %vm3731_vm8, %v1333_v21, %v1330_v2  ;;  %v3745_v26 = vsel %vm925_vm4, %v3327_v12, %v3557_v50  ;;  %v1246_v13 = vsel %vm3696_vm5, %v3687_v39, %v3694_v62  ;;  %v3769_v21 = vld [vmem:[%s4111_s1 + $0x68] sm:$0xff] }
 0x1f7   :  { %v597_v27 = vpop.f32.mrf.mxu2  ;;  %1783 = vxpose.xlu2.b32.cont [9/16] (narrow) %v1607_v5, 16  ;;  %v4283_v47 = vsub.f32 %v4281_v30, %v4282_v56  ;;  %v3754_v1 = vmin.f32 %v1032_v35, 1.0  ;;  %v1096_v2 = vmax.f32 %v3580_v24, 0.0  ;;  %v3757_v7 = vmin.f32 %v1022_v10, 1.0 }
 0x1f8   :  { %v710_v52 = vpop.f32.mrf.mxu3  ;;  %v3761_v50 = vpop.eup %2234  ;;  %v839_v46 = vmul.f32 1.442695, %v779_v3  ;;  %v598_v39 = vadd.f32 %v3205_v22, %v597_v27  ;;  %v1343_v62 = vand.u32 2147483647, %v3711_v51  ;;  %v1341_v35 = vadd.f32 1.0, %v1340_v58 }
 0x1f9   :  { %1752 = vxpose.xlu1.b32.cont [10/16] (narrow) %v4283_v47, 16  ;;  %v2237_v5 = vpop.eup %2236  ;;  %vm1480_vm10 = vcmp.lt.f32.partialorder %v1448_v29, %v3754_v1  ;;  %v3772_v10 = vadd.f32 %v1336_v31, %v1096_v2  ;;  %v874_v55 = vadd.f32 1.0, %v3761_v50  ;;  %v4284_v47 = vld [vmem:[#allocation26_spill] sm:$0xff]  ;;  %vm1468_vm11 = vcmp.lt.f32.partialorder %v3769_v21, %v3507_v34  ;;  %v4286_v2 = vld [vmem:[#allocation31_spill] sm:$0xff] }
 0x1fa   :  { %v2239_v3 = vpop.eup %2238  ;;  %2240 = vpow2.f32 %v839_v46  ;;  %v3775_v22 = vadd.f32 %v710_v52, %v598_v39  ;;  %v1990_v27 = vsel %vm1480_vm10, 1.0, %v4195_v33  ;;  %v969_v30 = vmul.f32 %v2237_v5, %v3711_v51  ;;  %v4300_v39 = vld [vmem:[#allocation38_spill] sm:$0xff] }
 0x1fb   :  { %v2051_v12 = vpack.i.bf16 %v1990_v27, %v4284_v47  ;;  %v1576_v56 = vmul.f32 %v1990_v27, %v3580_v24  ;;  %2242 = vrcp.f32 %v874_v55  ;;  %v3785_v58 = vmul.f32 %v3757_v7, %v3119_v14 }
 0x1fc   :  { %v748_v29 = vand.u32 2147483647, %v3775_v22  ;;  %v1001_v31 = vsel %vm937_vm9, %v2237_v5, %v969_v30  ;;  %v1339_v52 = vmul.f32 0.6931472, %v2239_v3  ;;  %2244 = vlog2.f32 %v874_v55  ;;  %v1449_v5 = vld [vmem:[%s4111_s1 + $0xd0] sm:$0xff] }
 0x1fd   :  { %4285 = vst [vmem:[#allocation22_spill] sm:$0xff] %v3785_v58  ;;  %v4287_v46 = vand.u32 2147483647, %v4286_v2  ;;  %2052 = vxpose.xlu0.b32.cont [10/16] (narrow) %v2051_v12, 16  ;;  %v1608_v27 = vsub.f32 %v1576_v56, %v3772_v10  ;;  %v1033_v47 = vmax.f32 %v1001_v31, 0.0  ;;  %v1349_v8 = vmul.f32 -0.5, %v3761_v50 }
 0x1fe   :  { %v4290_v40 = vmax.f32 %v3119_v14, 0.0  ;;  %v780_v19 = vsub.f32 0.0, %v748_v29  ;;  %v1097_v55 = vmax.f32 %v3625_v57, 0.0  ;;  %v1342_v3 = vmul.f32 %v3711_v51, %v1341_v35  ;;  %v4291_v56 = vld [vmem:[#allocation36_spill] sm:$0xff]  ;;  %v4292_v31 = vld [vmem:[#allocation35_spill] sm:$0xff] }
 0x1ff   :  { %vm3792_vm12 = vcmp.lt.f32.partialorder %v4287_v46, 0.0004427343  ;;  %v1021_v12 = vmax.f32 %v3745_v26, 0.0  ;;  %v600_v30 = vpop.f32.mrf.mxu2  ;;  %1784 = vxpose.xlu2.b32.cont [10/16] (narrow) %v1608_v27, 16  ;;  %v4293_v2 = vsub.f32 %v4291_v56, %v4292_v31  ;;  %vm3813_vm13 = vcmp.lt.f32.partialorder %v1343_v62, 0.0004427343 }
 0x200   :  { %v3800_v48 = vadd.f32 %v1246_v13, %v4290_v40  ;;  %v713_v46 = vpop.f32.mrf.mxu3  ;;  %v3811_v40 = vmin.f32 %v1033_v47, 1.0  ;;  %v3819_v29 = vmul.f32 %v3650_v49, %v3490_v15  ;;  %v3823_v26 = vpop.eup %2240  ;;  %v841_v35 = vmul.f32 1.442695, %v780_v19  ;;  %v2269_v27 = vld [vmem:[%s4115_s5] ss:$0 sm:$0xff] }
 0x201   :  { %1753 = vxpose.xlu1.b32.cont [11/16] (narrow) %v4293_v2, 16  ;;  %v601_v47 = vadd.f32 %v2269_v27, %v600_v30  ;;  %v1345_v62 = vsel %vm3813_vm13, %v1342_v3, %v1339_v52  ;;  %vm938_vm14 = vcmp.ge.f32.partialorder %v3670_v54, 0.0  ;;  %v2243_v56 = vpop.eup %2242  ;;  %v1350_v15 = vadd.f32 1.0, %v1349_v8  ;;  %v4296_v13 = vld [vmem:[#allocation33_spill] sm:$0xff] }
 0x202   :  { %vm1481_vm15 = vcmp.lt.f32.partialorder %v1449_v5, %v3811_v40  ;;  %v1352_v49 = vand.u32 2147483647, %v3761_v50  ;;  %v875_v2 = vadd.f32 1.0, %v3823_v26  ;;  %v2245_v51 = vpop.eup %2244  ;;  %2246 = vpow2.f32 %v841_v35 }
 0x203   :  { %v3834_v19 = vadd.f32 %v713_v46, %v601_v47  ;;  %v1991_v58 = vsel %vm1481_vm15, 1.0, %v4195_v33  ;;  %v970_v30 = vmul.f32 %v2243_v56, %v3761_v50  ;;  %v3839_v3 = vadd.f32 %v1345_v62, %v1097_v55  ;;  %v1450_v62 = vld [vmem:[%s4111_s1 + $0xd8] sm:$0xff] }
 0x204   :  { %v2053_v52 = vpack.i.bf16 %v1991_v58, %v4296_v13  ;;  %v1577_v31 = vmul.f32 %v1991_v58, %v3625_v57  ;;  %2248 = vrcp.f32 %v875_v2  ;;  %v1348_v4 = vmul.f32 0.6931472, %v2245_v51  ;;  %v4298_v13 = vld [vmem:[#allocation41_spill] sm:$0xff] }
 0x205   :  { %v749_v8 = vand.u32 2147483647, %v3834_v19  ;;  %v1002_v5 = vsel %vm938_vm14, %v2243_v56, %v970_v30  ;;  %2250 = vlog2.f32 %v875_v2  ;;  %v1358_v47 = vmul.f32 -0.5, %v3823_v26  ;;  %v4299_v30 = vld [vmem:[#allocation37_spill] sm:$0xff] }
 0x206   :  { %2054 = vxpose.xlu0.b32.cont [11/16] (narrow) %v2053_v52, 16  ;;  %v1609_v46 = vsub.f32 %v1577_v31, %v3839_v3  ;;  %v1034_v35 = vmax.f32 %v1002_v5, 0.0  ;;  %v1228_v55 = vsel %vm3792_vm12, %v4298_v13, %v4297_v38  ;;  %v1351_v56 = vmul.f32 %v3761_v50, %v1350_v15 }
 0x207   :  { %v781_v58 = vsub.f32 0.0, %v749_v8  ;;  %v3859_v31 = vsel %vm1468_vm11, 1.0, %v4195_v33  ;;  %v3861_v51 = vmin.f32 %v1021_v12, 1.0  ;;  %v603_v2 = vpop.f32.mrf.mxu2  ;;  %v4301_v38 = vsub.f32 %v4299_v30, %v4300_v39 }
 0x208   :  { %1785 = vxpose.xlu2.b32.cont [11/16] (narrow) %v1609_v46, 16  ;;  %v716_v52 = vpop.f32.mrf.mxu3  ;;  %v3866_v8 = vmin.f32 %v1034_v35, 1.0  ;;  %v1098_v5 = vmax.f32 %v3670_v54, 0.0  ;;  %vm3869_vm0 = vcmp.lt.f32.partialorder %v1352_v49, 0.0004427343  ;;  %v3875_v12 = vpop.eup %2246  ;;  %v604_v46 = vadd.f32 %v2269_v27, %v603_v2  ;;  %v4304_v2 = vld [vmem:[#allocation34_spill] sm:$0xff] }
 0x209   :  { %1754 = vxpose.xlu1.b32.cont [12/16] (narrow) %v4301_v38, 16  ;;  %v843_v15 = vmul.f32 1.442695, %v781_v58  ;;  %v1354_v13 = vsel %vm3869_vm0, %v1351_v56, %v1348_v4  ;;  %vm939_vm1 = vcmp.ge.f32.partialorder %v3720_v37, 0.0  ;;  %v1359_v30 = vadd.f32 1.0, %v1358_v47 }
 0x20a   :  { %v2249_v35 = vpop.eup %2248  ;;  %vm1482_vm2 = vcmp.lt.f32.partialorder %v1450_v62, %v3866_v8  ;;  %v1361_v49 = vand.u32 2147483647, %v3823_v26  ;;  %v876_v38 = vadd.f32 1.0, %v3875_v12  ;;  %v3883_v21 = vadd.f32 %v716_v52, %v604_v46  ;;  %v1452_v62 = vld [vmem:[%s4111_s1 + $0xe8] sm:$0xff] }
 0x20b   :  { %v2251_v34 = vpop.eup %2250  ;;  %2252 = vpow2.f32 %v843_v15  ;;  %v1992_v58 = vsel %vm1482_vm2, 1.0, %v4195_v33  ;;  %v971_v27 = vmul.f32 %v2249_v35, %v3823_v26  ;;  %v3888_v56 = vadd.f32 %v1354_v13, %v1098_v5  ;;  %v1437_v5 = vld [vmem:[%s4111_s1 + $0x70] sm:$0xff] }
 0x20c   :  { %v2055_v4 = vpack.i.bf16 %v1992_v58, %v4304_v2  ;;  %v1578_v50 = vmul.f32 %v1992_v58, %v3670_v54  ;;  %2254 = vrcp.f32 %v876_v38  ;;  %v4305_v47 = vand.u32 2147483647, %v3235_v9 }
 0x20d   :  { %v750_v52 = vand.u32 2147483647, %v3883_v21  ;;  %v1003_v15 = vsel %vm939_vm1, %v2249_v35, %v971_v27  ;;  %v1357_v46 = vmul.f32 0.6931472, %v2251_v34  ;;  %2256 = vlog2.f32 %v876_v38  ;;  %v1451_v34 = vld [vmem:[%s4111_s1 + $0xe0] sm:$0xff] }
 0x20e   :  { %vm3893_vm3 = vcmp.lt.f32.partialorder %v4305_v47, 0.0004427343  ;;  %2056 = vxpose.xlu0.b32.cont [12/16] (narrow) %v2055_v4, 16  ;;  %v1610_v13 = vsub.f32 %v1578_v50, %v3888_v56  ;;  %v1035_v58 = vmax.f32 %v1003_v15, 0.0  ;;  %v4308_v9 = vmax.f32 %v3012_v16, 0.0 }
 0x20f   :  { %v1367_v47 = vmul.f32 -0.5, %v3875_v12  ;;  %v782_v39 = vsub.f32 0.0, %v750_v52  ;;  %v1360_v35 = vmul.f32 %v3823_v26, %v1359_v30  ;;  %v1564_v38 = vmul.f32 %v3859_v31, %v3012_v16 }
 0x210   :  { %v3906_v2 = vadd.f32 %v1228_v55, %v4308_v9  ;;  %v1231_v27 = vmul.f32 0.6931472, %v3409_v28  ;;  %1786 = vxpose.xlu2.b32.cont [12/16] (narrow) %v1610_v13, 16  ;;  %v4309_v4 = vsub.f32 %v3290_v63, %v3251_v43  ;;  %v3919_v55 = vmin.f32 %v1035_v58, 1.0 }
 0x211   :  { %vm3921_vm4 = vcmp.lt.f32.partialorder %v1361_v49, 0.0004427343  ;;  %vm1469_vm5 = vcmp.lt.f32.partialorder %v1437_v5, %v3861_v51  ;;  %v3928_v26 = vmul.f32 %v3703_v41, %v3533_v59  ;;  %v3930_v30 = vpop.eup %2252  ;;  %v845_v28 = vmul.f32 1.442695, %v782_v39 }
 0x212   :  { %1755 = vxpose.xlu1.b32.cont [13/16] (narrow) %v4309_v4, 16  ;;  %v1099_v52 = vmax.f32 %v3720_v37, 0.0  ;;  %v1363_v63 = vsel %vm3921_vm4, %v1360_v35, %v1357_v46  ;;  %vm940_vm6 = vcmp.ge.f32.partialorder %v3775_v22, 0.0  ;;  %v2255_v49 = vpop.eup %2254  ;;  %vm1483_vm7 = vcmp.lt.f32.partialorder %v1451_v34, %v3919_v55  ;;  %v4312_v46 = vld [vmem:[#allocation42_spill] sm:$0xff] }
 0x213   :  { %v1368_v15 = vadd.f32 1.0, %v1367_v47  ;;  %v1370_v13 = vand.u32 2147483647, %v3875_v12  ;;  %v877_v58 = vadd.f32 1.0, %v3930_v30  ;;  %v2257_v59 = vpop.eup %2256  ;;  %2258 = vpow2.f32 %v845_v28 }
 0x214   :  { %v1993_v41 = vsel %vm1483_vm7, 1.0, %v4195_v33  ;;  %v972_v39 = vmul.f32 %v2255_v49, %v3875_v12  ;;  %v3944_v4 = vadd.f32 %v1363_v63, %v1099_v52  ;;  %v1366_v50 = vmul.f32 0.6931472, %v2257_v59  ;;  %v1438_v63 = vld [vmem:[%s4111_s1 + $0x78] sm:$0xff] }
 0x215   :  { %v2057_v35 = vpack.i.bf16 %v1993_v41, %v4312_v46  ;;  %v1579_v34 = vmul.f32 %v1993_v41, %v3720_v37  ;;  %2260 = vrcp.f32 %v877_v58  ;;  %v1237_v28 = vsel %vm3893_vm3, %v3422_v20, %v1231_v27 }
 0x216   :  { %v1004_v47 = vsel %vm940_vm6, %v2255_v49, %v972_v39  ;;  %2262 = vlog2.f32 %v877_v58  ;;  %v1596_v43 = vsub.f32 %v1564_v38, %v3906_v2  ;;  %v1979_v52 = vsel %vm1469_vm5, 1.0, %v4195_v33 }
 0x217   :  { %2058 = vxpose.xlu0.b32.cont [13/16] (narrow) %v2057_v35, 16  ;;  %v1611_v16 = vsub.f32 %v1579_v34, %v3944_v4  ;;  %v1036_v9 = vmax.f32 %v1004_v47, 0.0  ;;  %v1369_v20 = vmul.f32 %v3875_v12, %v1368_v15  ;;  %v1085_v27 = vmax.f32 %v3059_v32, 0.0 }
 0x218   :  { %v1376_v49 = vmul.f32 -0.5, %v3930_v30  ;;  %vm3966_vm8 = vcmp.lt.f32.partialorder %v1370_v13, 0.0004427343  ;;  %v1565_v12 = vmul.f32 %v1979_v52, %v3059_v32  ;;  %vm1470_vm9 = vcmp.lt.f32.partialorder %v1438_v63, %v3757_v7 }
 0x219   :  { %1787 = vxpose.xlu2.b32.cont [13/16] (narrow) %v1611_v16, 16  ;;  %v3964_v38 = vmin.f32 %v1036_v9, 1.0  ;;  %v2259_v58 = vpop.eup %2258  ;;  %v1372_v59 = vsel %vm3966_vm8, %v1369_v20, %v1366_v50  ;;  %v3972_v41 = vadd.f32 %v1237_v28, %v1085_v27  ;;  %v1100_v16 = vmax.f32 %v3775_v22, 0.0 }
 0x21a   :  { %1756 = vxpose.xlu1.b32.cont [14/16] (narrow) %v1596_v43, 16  ;;  %vm941_vm11 = vcmp.ge.f32.partialorder %v3834_v19, 0.0  ;;  %v878_v43 = vadd.f32 1.0, %v2259_v58  ;;  %v1377_v46 = vadd.f32 1.0, %v1376_v49  ;;  %v1379_v35 = vand.u32 2147483647, %v3930_v30 }
 0x21b   :  { %v2261_v15 = vpop.eup %2260  ;;  %vm1484_vm10 = vcmp.lt.f32.partialorder %v1452_v62, %v3964_v38  ;;  %v3983_v47 = vadd.f32 %v1372_v59, %v1100_v16  ;;  %v1597_v27 = vsub.f32 %v1565_v12, %v3972_v41  ;;  %v1453_v49 = vld [vmem:[%s4111_s1 + $0xf0] sm:$0xff]  ;;  %v1980_v59 = vsel %vm1470_vm9, 1.0, %v4195_v33 }
 0x21c   :  { %v2263_v13 = vpop.eup %2262  ;;  %v1994_v39 = vsel %vm1484_vm10, 1.0, %v4195_v33  ;;  %v973_v9 = vmul.f32 %v2261_v15, %v3930_v30  ;;  %2264 = vrcp.f32 %v878_v43  ;;  %v1385_v16 = vmul.f32 -0.5, %v2259_v58 }
 0x21d   :  { %v2059_v34 = vpack.i.bf16 %v1994_v39, %v3859_v31  ;;  %v1580_v50 = vmul.f32 %v1994_v39, %v3775_v22  ;;  %v1375_v62 = vmul.f32 0.6931472, %v2263_v13  ;;  %2266 = vlog2.f32 %v878_v43 }
 0x21e   :  { %v1005_v28 = vsel %vm941_vm11, %v2261_v15, %v973_v9  ;;  %v1378_v31 = vmul.f32 %v3930_v30, %v1377_v46  ;;  %vm1380_vm12 = vcmp.lt.f32.partialorder %v1379_v35, 0.0004427343  ;;  %v1101_v12 = vmax.f32 %v3834_v19, 0.0 }
 0x21f   :  { %2060 = vxpose.xlu0.b32.cont [14/16] (narrow) %v2059_v34, 16  ;;  %v1612_v20 = vsub.f32 %v1580_v50, %v3983_v47  ;;  %v1037_v5 = vmax.f32 %v1005_v28, 0.0  ;;  %v1566_v39 = vmul.f32 %v1980_v59, %v3119_v14  ;;  %vm942_vm14 = vcmp.ge.f32.partialorder %v3883_v21, 0.0 }
 0x220   :  { %v1381_v43 = vsel %vm1380_vm12, %v1378_v31, %v1375_v62  ;;  %v1386_v7 = vadd.f32 1.0, %v1385_v16  ;;  %v1388_v35 = vand.u32 2147483647, %v2259_v58  ;;  %v1102_v16 = vmax.f32 %v3883_v21, 0.0 }
 0x221   :  { %1788 = vxpose.xlu2.b32.cont [14/16] (narrow) %v1612_v20, 16  ;;  %v1069_v15 = vmin.f32 %v1037_v5, 1.0  ;;  %v3999_v46 = vadd.f32 %v1381_v43, %v1101_v12  ;;  %v1598_v14 = vsub.f32 %v1566_v39, %v3800_v48  ;;  %v1454_v5 = vld [vmem:[%s4111_s1 + $0xf8] sm:$0xff]  ;;  %s2297_s1 = smov [#allocation2]  }
 0x222   :  { %1757 = vxpose.xlu1.b32.cont [15/16] (narrow) %v1597_v27, 16  ;;  %v2265_v13 = vpop.eup %2264  ;;  %vm1389_vm15 = vcmp.lt.f32.partialorder %v1388_v35, 0.0004427343  ;;  %s1887_s25 = sshll.u32 %s2297_s1, 4  ;;  %s1888_s25 = int_to_ptr.vmem [resolvable:$true] %s1887_s25 }
 0x223   :  { %vm1485_vm13 = vcmp.lt.f32.partialorder %v1453_v49, %v1069_v15  ;;  %v2267_v9 = vpop.eup %2266  ;;  %v974_v30 = vmul.f32 %v2265_v13, %v2259_v58  ;;  %v1387_v49 = vmul.f32 %v2259_v58, %v1386_v7  ;;  %v1640_v58 = vmul.f32 %v3754_v1, %v3580_v24  ;;  %v4318_v7 = vld [vmem:[#allocation5_spill] sm:$0xff]  ;;  %v4325_v1 = vld [vmem:[#allocation10_spill] sm:$0xff] }
 0x224   :  { %v1995_v34 = vsel %vm1485_vm13, 1.0, %v4195_v33  ;;  %v1384_v62 = vmul.f32 0.6931472, %v2267_v9  ;;  %v1641_v24 = vmul.f32 %v3811_v40, %v3625_v57  ;;  %v4324_v57 = vld [vmem:[#allocation9_spill] sm:$0xff]  ;;  %v4328_v40 = vld [vmem:[#allocation47_spill] sm:$0xff] }
 0x225   :  { %v2061_v63 = vpack.i.bf16 %v1995_v34, %v1979_v52  ;;  %v1581_v50 = vmul.f32 %v1995_v34, %v3834_v19  ;;  %v1006_v28 = vsel %vm942_vm14, %v2265_v13, %v974_v30  ;;  %v4315_v34 = vsub.f32 %v3355_v0, %v3391_v61 }
 0x226   :  { %v1038_v27 = vmax.f32 %v1006_v28, 0.0  ;;  %v1390_v31 = vsel %vm1389_vm15, %v1387_v49, %v1384_v62  ;;  %v1672_v30 = vsub.f32 %v3772_v10, %v1640_v58  ;;  %v4320_v0 = vsub.f32 %v3444_v17, %v3484_v23  ;;  %v4327_v23 = vld [vmem:[#allocation46_spill] sm:$0xff]  ;;  %v4342_v49 = vld [vmem:[#allocation17_spill] sm:$0xff]  ;;  %v4352_v58 = vld [vmem:[#allocation23_spill] sm:$0xff] }
 0x227   :  { %2062 = vxpose.xlu0.b32.cont [15/16] (narrow) %v2061_v63, 16  ;;  %v1613_v20 = vsub.f32 %v1581_v50, %v3999_v46  ;;  %v4009_v12 = vadd.f32 %v1390_v31, %v1102_v16  ;;  %v4319_v63 = vsub.f32 %v2730_v42, %v4318_v7  ;;  %v1673_v61 = vsub.f32 %v3839_v3, %v1641_v24  ;;  %v4360_v24 = vld [vmem:[#allocation30_spill] sm:$0xff] }
 0x228   :  { %v1070_v52 = vmin.f32 %v1038_v27, 1.0  ;;  %v4323_v42 = vsub.f32 %v3486_v6, %v3527_v25  ;;  %v4326_v10 = vsub.f32 %v4324_v57, %v4325_v1  ;;  %v1643_v17 = vmul.f32 %v3919_v55, %v3720_v37  ;;  %v4333_v25 = vld [vmem:[#allocation48_spill] sm:$0xff]  ;;  %v4337_v55 = vld [vmem:[#allocation25_spill] sm:$0xff] }
 0x229   :  { %1789 = vxpose.xlu2.b32.cont [15/16] (narrow) %v1613_v20, 16  ;;  %v1644_v6 = vmul.f32 %v3964_v38, %v3775_v22  ;;  %v4336_v37 = vld [vmem:[#allocation16_spill] sm:$0xff]  ;;  %v1645_v20 = vmul.f32 %v1069_v15, %v3834_v19  ;;  %v4347_v19 = vld [vmem:[#allocation43_spill] sm:$0xff] }
 0x22a   :  { %1758 = vxpose.xlu1.b32.end [16/16] (narrow) %v1598_v14, 16  ;;  %vm1486_vm0 = vcmp.lt.f32.partialorder %v1454_v5, %v1070_v52  ;;  %v1675_v3 = vsub.f32 %v3944_v4, %v1643_v17  ;;  %v4338_v62 = vsub.f32 %v4336_v37, %v4337_v55  ;;  %v4339_v4 = vld [vmem:[#allocation50_spill] sm:$0xff]  ;;  %v4340_v14 = vld [vmem:[#allocation20_spill] sm:$0xff]  ;;  %v1646_v31 = vmul.f32 %v1070_v52, %v3883_v21  ;;  %v4355_v52 = vld [vmem:[#allocation27_spill] sm:$0xff] }
 0x22b   :  { %v1996_v43 = vsel %vm1486_vm0, 1.0, %v4195_v33  ;;  %v4316_v33 = vsub.f32 %v3320_v60, %v3353_v18  ;;  %v4321_v60 = vld [vmem:[#allocation6_spill] sm:$0xff]  ;;  %v1676_v28 = vsub.f32 %v3983_v47, %v1644_v6  ;;  %v4341_v27 = vsub.f32 %v4339_v4, %v4340_v14  ;;  %v4343_v22 = vld [vmem:[#allocation32_spill] sm:$0xff]  ;;  %v4366_v6 = vld [vmem:[#allocation45_spill] sm:$0xff] }
 0x22c   :  { %v2063_v13 = vpack.i.bf16 %v1996_v43, %v1980_v59  ;;  %v1582_v39 = vmul.f32 %v1996_v43, %v3883_v21  ;;  %v4317_v59 = vsub.f32 %v3399_v36, %v3442_v45  ;;  %v4322_v18 = vsub.f32 %v2793_v53, %v4321_v60  ;;  %v4346_v43 = vld [vmem:[#allocation21_spill] sm:$0xff]  ;;  %v4353_v21 = vld [vmem:[#allocation8_spill] sm:$0xff]  ;;  %v4361_v60 = vld [vmem:[#allocation38_spill] sm:$0xff] }
 0x22d   :  { %v1642_v36 = vmul.f32 %v3866_v8, %v3670_v54  ;;  %v4329_v53 = vsub.f32 %v4327_v23, %v4328_v40  ;;  %v4330_v54 = vld [vmem:[#allocation13_spill] sm:$0xff]  ;;  %v4331_v8 = vld [vmem:[#allocation14_spill] sm:$0xff]  ;;  %v1677_v5 = vsub.f32 %v3999_v46, %v1645_v20  ;;  %v4344_v38 = vsub.f32 %v4342_v49, %v4343_v22  ;;  %v4350_v46 = vld [vmem:[#allocation7_spill] sm:$0xff] }
 0x22e   :  { %v1614_v9 = vsub.f32 %v1582_v39, %v4009_v12  ;;  %v4332_v50 = vsub.f32 %v4330_v54, %v4331_v8  ;;  %v4345_v47 = vsub.f32 %v3666_v11, %v3819_v29  ;;  %v1678_v16 = vsub.f32 %v4009_v12, %v1646_v31  ;;  %v4351_v39 = vld [vmem:[#allocation19_spill] sm:$0xff]  ;;  %v4354_v11 = vld [vmem:[#allocation24_spill] sm:$0xff]  ;;  %v4367_v37 = vld [vmem:[#allocation22_spill] sm:$0xff] }
 0x22f   :  { %2064 = vxpose.xlu0.b32.end [16/16] (narrow) %v2063_v13, 16  ;;  %v1674_v45 = vsub.f32 %v3888_v56, %v1642_v36  ;;  %v4334_v56 = vld [vmem:[#allocation49_spill] sm:$0xff]  ;;  %v4348_v15 = vsub.f32 %v4346_v43, %v4347_v19  ;;  %v4349_v13 = vsub.f32 %v3716_v44, %v3928_v26  ;;  %v1624_v29 = vmul.f32 %v4354_v11, %v4353_v21  ;;  %v4359_v26 = vld [vmem:[#allocation12_spill] sm:$0xff] }
 0x230   :  { %v4335_v35 = vsub.f32 %v4333_v25, %v4334_v56  ;;  %v1629_v56 = vmul.f32 %v3861_v51, %v3059_v32  ;;  %v4368_v55 = vsub.f32 %v3800_v48, %v4367_v37 }
 0x231   :  { %1790 = vxpose.xlu2.b32.end [16/16] (narrow) %v1614_v9, 16  ;;  %v1623_v9 = vmul.f32 %v4351_v39, %v4350_v46  ;;  %v1656_v12 = vsub.f32 %v4355_v52, %v1624_v29 }
 0x232   :  { %1839 = vxpose.xlu1.b32.start [1/16] (narrow) %v4315_v34, 16 }
 0x233   :  { %v1655_v34 = vsub.f32 %v4352_v58, %v1623_v9 }
 0x237   :  { %1807 = vxpose.xlu0.b32.start [1/16] (narrow) %v4316_v33, 16  ;;  %v4356_v33 = vld [vmem:[#allocation11_spill] sm:$0xff] }
 0x23a   :  { %1840 = vxpose.xlu1.b32.cont [2/16] (narrow) %v4317_v59, 16  ;;  %v4357_v59 = vld [vmem:[#allocation28_spill] sm:$0xff] }
 0x23b   :  { %v1625_v7 = vmul.f32 %v4357_v59, %v4356_v33 }
 0x23f   :  { %1808 = vxpose.xlu0.b32.cont [2/16] (narrow) %v4319_v63, 16  ;;  %v4358_v63 = vld [vmem:[#allocation35_spill] sm:$0xff] }
 0x240   :  { %v1657_v44 = vsub.f32 %v4358_v63, %v1625_v7 }
 0x242   :  { %1841 = vxpose.xlu1.b32.cont [3/16] (narrow) %v4320_v0, 16  ;;  %v1626_v0 = vmul.f32 %v4360_v24, %v4359_v26 }
 0x247   :  { %1809 = vxpose.xlu0.b32.cont [3/16] (narrow) %v4322_v18, 16  ;;  %v1658_v18 = vsub.f32 %v4361_v60, %v1626_v0 }
 0x24a   :  { %1842 = vxpose.xlu1.b32.cont [4/16] (narrow) %v4323_v42, 16 }
 0x24f   :  { %1810 = vxpose.xlu0.b32.cont [4/16] (narrow) %v4326_v10, 16  ;;  %v4363_v10 = vld [vmem:[#allocation39_spill] sm:$0xff] }
 0x252   :  { %1843 = vxpose.xlu1.b32.cont [5/16] (narrow) %v4329_v53, 16  ;;  %v1791_v1 = vpop.trf.xlu2 }
 0x253   :  { %1876 = vst [vmem:[#allocation2 + $0x28] sm:$0xff] %v1791_v1 }
 0x256   :  { %v1759_v36 = vpop.trf.xlu1 }
 0x257   :  { %1811 = vxpose.xlu0.b32.cont [5/16] (narrow) %v4332_v50, 16  ;;  %1875 = vst [vmem:[#allocation2 + $0x20] sm:$0xff] %v1759_v36  ;;  %v4365_v50 = vld [vmem:[#allocation18_spill] sm:$0xff] }
 0x258   :  { %v1628_v25 = vmul.f32 %v4366_v6, %v4365_v50 }
 0x25a   :  { %1844 = vxpose.xlu1.b32.cont [6/16] (narrow) %v4335_v35, 16  ;;  %v1661_v35 = vsub.f32 %v3972_v41, %v1629_v56 }
 0x25e   :  { %v1760_v53 = vpop.trf.xlu1 }
 0x25f   :  { %1812 = vxpose.xlu0.b32.cont [6/16] (narrow) %v4338_v62, 16  ;;  %1877 = vst [vmem:[#allocation2 + $0x30] sm:$0xff] %v1760_v53 }
 0x262   :  { %1845 = vxpose.xlu1.b32.cont [7/16] (narrow) %v4341_v27, 16 }
 0x267   :  { %1813 = vxpose.xlu0.b32.cont [7/16] (narrow) %v4344_v38, 16 }
 0x26a   :  { %1846 = vxpose.xlu1.b32.cont [8/16] (narrow) %v4345_v47, 16 }
 0x26f   :  { %1814 = vxpose.xlu0.b32.cont [8/16] (narrow) %v4348_v15, 16 }
 0x272   :  { %1847 = vxpose.xlu1.b32.cont [9/16] (narrow) %v4349_v13, 16 }
 0x277   :  { %1815 = vxpose.xlu0.b32.cont [9/16] (narrow) %v1655_v34, 16 }
 0x27a   :  { %1848 = vxpose.xlu1.b32.cont [10/16] (narrow) %v1672_v30, 16  ;;  %v2065_v30 = vpop.trf.xlu0 }
 0x27b   :  { %v2069_v42 = vunpack.i.h.bf16 %v2065_v30  ;;  %v2066_v57 = vunpack.i.l.bf16 %v2065_v30 }
 0x27d   :  { %1872 = vst [vmem:[#allocation2 + $0x8] sm:$0xff] %v2069_v42 }
 0x27e   :  { %1871 = vst [vmem:[#allocation2] sm:$0xff] %v2066_v57 }
 0x27f   :  { %1816 = vxpose.xlu0.b32.cont [10/16] (narrow) %v1656_v12, 16 }
 0x282   :  { %1849 = vxpose.xlu1.b32.cont [11/16] (narrow) %v1673_v61, 16  ;;  %v4362_v61 = vld [vmem:[#allocation15_spill] sm:$0xff]  ;;  %v2070_v40 = vpop.trf.xlu0 }
 0x283   :  { %v1627_v17 = vmul.f32 %v4363_v10, %v4362_v61  ;;  %v2074_v54 = vunpack.i.h.bf16 %v2070_v40  ;;  %v2071_v8 = vunpack.i.l.bf16 %v2070_v40 }
 0x285   :  { %1874 = vst [vmem:[#allocation2 + $0x18] sm:$0xff] %v2074_v54 }
 0x286   :  { %1873 = vst [vmem:[#allocation2 + $0x10] sm:$0xff] %v2071_v8 }
 0x287   :  { %1817 = vxpose.xlu0.b32.cont [11/16] (narrow) %v1657_v44, 16 }
 0x28a   :  { %1850 = vxpose.xlu1.b32.cont [12/16] (narrow) %v1674_v45, 16  ;;  %v4364_v45 = vld [vmem:[#allocation40_spill] sm:$0xff] }
 0x28b   :  { %v1659_v23 = vsub.f32 %v4364_v45, %v1627_v17 }
 0x28f   :  { %1818 = vxpose.xlu0.b32.cont [12/16] (narrow) %v1658_v18, 16 }
 0x292   :  { %1851 = vxpose.xlu1.b32.cont [13/16] (narrow) %v1675_v3, 16  ;;  %v1660_v3 = vsub.f32 %v3906_v2, %v1628_v25 }
 0x297   :  { %1819 = vxpose.xlu0.b32.cont [13/16] (narrow) %v1659_v23, 16 }
 0x29a   :  { %1852 = vxpose.xlu1.b32.cont [14/16] (narrow) %v1676_v28, 16  ;;  %v1792_v28 = vpop.trf.xlu2 }
 0x29b   :  { %1878 = vst [vmem:[#allocation2 + $0x38] sm:$0xff] %v1792_v28 }
 0x29f   :  { %1820 = vxpose.xlu0.b32.cont [14/16] (narrow) %v1660_v3, 16 }
 0x2a2   :  { %1853 = vxpose.xlu1.b32.cont [15/16] (narrow) %v1677_v5, 16 }
 0x2a7   :  { %1821 = vxpose.xlu0.b32.cont [15/16] (narrow) %v1661_v35, 16 }
 0x2aa   :  { %1854 = vxpose.xlu1.b32.end [16/16] (narrow) %v1678_v16, 16 }
 0x2af   :  { %1822 = vxpose.xlu0.b32.end [16/16] (narrow) %v4368_v55, 16 }
 0x2d6   :  { %v1855_v62 = vpop.trf.xlu1 }
 0x2d7   :  { %1880 = vst [vmem:[#allocation2 + $0x48] sm:$0xff] %v1855_v62 }
 0x2db   :  { %v1823_v20 = vpop.trf.xlu0 }
 0x2dc   :  { %1879 = vst [vmem:[#allocation2 + $0x40] sm:$0xff] %v1823_v20 }
 0x2de   :  { %v1856_v2 = vpop.trf.xlu1 }
 0x2df   :  { %1882 = vst [vmem:[#allocation2 + $0x58] sm:$0xff] %v1856_v2 }
 0x2e3   :  { %v1824_v32 = vpop.trf.xlu0 }
 0x2e4   :  { %1881 = vst [vmem:[#allocation2 + $0x50] sm:$0xff] %v1824_v32 }
 0x2e5   :  { %1895 = dma.vmem_to_hbm [thread:$0]  %s1888_s25, 1536, %s1890_s28, [#allocation3], %s2298_s29, %s2298_s29, %s2299_s30  }
 0x2e6   :  { %2294 = dma.done.wait [#allocation3], 1536  }
 0x2e7   :  { %2295 = vsyncadd [#allocation3], 4294965760 }
 0x2e8   :  { %1900 = vsyncpa [#allocation3], 1 }

</bundles_post_ra>
